<compile_context>
chip_gen: v7x
topology: tpu7x:2x2x1
jax: 0.10.0
libtpu: 0.0.40
codegen_flags: <defaults>
</compile_context>

<pallas_src>
import math

import jax
import jax.numpy as jnp
from jax.experimental import pallas as pl
from jax.experimental.pallas import tpu as pltpu


# ----------------------------- kernel -----------------------------------


def _layer_norm(h, g, b, eps=1e-5):
    mu = jnp.mean(h, axis=-1, keepdims=True)
    var = jnp.mean((h - mu) ** 2, axis=-1, keepdims=True)
    return (h - mu) * jax.lax.rsqrt(var + eps) * g + b


def make_encoder_kernel(num_layers, b_blk, seq, d_model, has_norm, exp_bf16):
    """Fused encoder stack: one grid step = one (batch_block, layer) pair."""

    bf16 = jnp.bfloat16

    def kernel(x_ref, bias_ref,
               wq_ref, wk_ref, wv_ref, wo_ref,
               ln1g_ref, ln1b_ref,
               w1_ref, b1_ref, w2_ref, b2_ref,
               ln2g_ref, ln2b_ref,
               *rest):
        if has_norm:
            fng_ref, fnb_ref, out_ref = rest
        else:
            (out_ref,) = rest

        layer = pl.program_id(1)

        # Load the residual stream into the (VMEM-resident) output block at the
        # first layer of this batch block; it stays resident across the layer
        # axis because the out BlockSpec index does not depend on `layer`.
        @pl.when(layer == 0)
        def _():
            out_ref[...] = x_ref[...]

        x = out_ref[...]                                    # (b_blk*seq, D) f32

        # --- self-attention sub-block (pre-LN) ---
        h = _layer_norm(x, ln1g_ref[0], ln1b_ref[0])
        hb = h.astype(bf16)
        # Three lane-dense (D,D) dots; 1/sqrt(D) is pre-folded into wq.
        q = jnp.dot(hb, wq_ref[0], preferred_element_type=jnp.float32)
        k = jnp.dot(hb, wk_ref[0], preferred_element_type=jnp.float32)
        v = jnp.dot(hb, wv_ref[0], preferred_element_type=jnp.float32)
        q = q.reshape(b_blk, seq, d_model)
        k = k.reshape(b_blk, seq, d_model)
        v = v.reshape(b_blk, seq, d_model)

        s = jnp.einsum("bqd,bkd->bqk",
                       q.astype(bf16), k.astype(bf16),
                       preferred_element_type=jnp.float32)
        # bias stored bf16 (bandwidth), accumulated in f32 (precision).
        s = s + bias_ref[...].astype(jnp.float32)

        # numerically-stable softmax over keys
        s = s - jnp.max(s, axis=-1, keepdims=True)
        if exp_bf16:                                        # v6e / v7x bf16 EUP
            p_b = jnp.exp(s.astype(bf16))
            denom = jnp.sum(p_b.astype(jnp.float32), axis=-1, keepdims=True)
        else:                                               # v5e: f32 EUP only
            p = jnp.exp(s)
            denom = jnp.sum(p, axis=-1, keepdims=True)
            p_b = p.astype(bf16)
        inv = pl.reciprocal(denom, approx=True)             # (b, seq, 1)

        attn = jnp.einsum("bqk,bkd->bqd", p_b, v.astype(bf16),
                          preferred_element_type=jnp.float32)
        attn = attn * inv                                    # normalize after p.v
        attn = attn.reshape(b_blk * seq, d_model)
        x = x + jnp.dot(attn.astype(bf16), wo_ref[0],
                        preferred_element_type=jnp.float32)

        # --- feed-forward sub-block (pre-LN) ---
        h2 = _layer_norm(x, ln2g_ref[0], ln2b_ref[0])
        f = jnp.dot(h2.astype(bf16), w1_ref[0],
                    preferred_element_type=jnp.float32) + b1_ref[0]
        f = jnp.maximum(f, 0.0)
        f = jnp.dot(f.astype(bf16), w2_ref[0],
                    preferred_element_type=jnp.float32) + b2_ref[0]
        x = x + f

        # Write the residual back into the resident out block; apply the
        # optional final norm in place at the last layer (single store each).
        if has_norm:
            @pl.when(layer == num_layers - 1)
            def _():
                out_ref[...] = _layer_norm(x, fng_ref[...], fnb_ref[...]
                                           ).astype(out_ref.dtype)

            @pl.when(layer != num_layers - 1)
            def _():
                out_ref[...] = x.astype(out_ref.dtype)
        else:
            out_ref[...] = x.astype(out_ref.dtype)

    return kernel


# ----------------------------- wrapper -----------------------------------


def _bf16_exp_ok():
    """bf16 EUP path exists on v6e / v7x; not on v5e (or older)."""
    try:
        kind = jax.devices()[0].device_kind.lower()
    except Exception:
        return False
    return ("v6" in kind) or ("v7" in kind)


def _vmem_limit_bytes(b_blk, S, D, F):
    f32b, bf16b = 4, 2
    x_blk = b_blk * S * D * f32b
    out_blk = b_blk * S * D * f32b
    bias_blk = b_blk * S * S * bf16b
    w_layer = (4 * D * D + 2 * D * F) * bf16b + (2 * F + 8 * D) * f32b
    act = (3 * b_blk * S * D + 2 * b_blk * S * S + b_blk * S * F) * f32b
    est = 2 * x_blk + 2 * out_blk + 2 * bias_blk + 2 * w_layer + act
    # 2x headroom, floor above the scoped defaults, cap below v7x's 64 MiB.
    return int(min(max(2 * est, 32 << 20), 56 << 20))


def encoder_forward(x, attn_mask, adj_mats, stacked, norm_params, *, batch_block=None):
    """Mirrors Encoder.forward: loop layers (fused on the grid), then optional norm."""
    B, S, D = x.shape
    L = stacked["wq"].shape[0]
    F = stacked["w1"].shape[-1]
    has_norm = norm_params is not None

    if batch_block is None:
        # >= 2 batch blocks so the "parallel" axis can shard across both v7x cores.
        b_blk = B // 2 if (B % 2 == 0 and B >= 2) else B
    else:
        b_blk = batch_block
    assert B % b_blk == 0
    nb = B // b_blk

    # Fold the two additive attention biases into one bf16 tensor (halves the
    # dominant bias DMA stream); re-expanded to f32 inside the kernel.
    bias = (attn_mask + adj_mats).astype(jnp.bfloat16)
    # Lane-friendly flattened residual slab (B*S rows, D on lanes).
    x2d = x.reshape(B * S, D).astype(jnp.float32)

    weight_keys = ["wq", "wk", "wv", "wo", "ln1_g", "ln1_b",
                   "w1", "b1", "w2", "b2", "ln2_g", "ln2_b"]
    args = [x2d, bias] + [stacked[k] for k in weight_keys]

    def per_layer_spec(a):
        nz = a.ndim - 1
        return pl.BlockSpec((1,) + a.shape[1:],
                            lambda bb, l, _nz=nz: (l,) + (0,) * _nz)

    in_specs = [
        pl.BlockSpec((b_blk * S, D), lambda bb, l: (bb, 0)),     # x (once / block)
        pl.BlockSpec((b_blk, S, S), lambda bb, l: (bb, 0, 0)),   # combined bias (bf16)
    ] + [per_layer_spec(stacked[k]) for k in weight_keys]

    if has_norm:
        args += [norm_params["g"], norm_params["b"]]
        in_specs += [pl.BlockSpec((1, D), lambda bb, l: (0, 0)),
                     pl.BlockSpec((1, D), lambda bb, l: (0, 0))]

    kernel = make_encoder_kernel(L, b_blk, S, D, has_norm, _bf16_exp_ok())

    out = pl.pallas_call(
        kernel,
        out_shape=jax.ShapeDtypeStruct((B * S, D), jnp.float32),
        grid=(nb, L),
        in_specs=in_specs,
        # Residual stream is carried in this block: its index is constant
        # along the layer axis, so it stays VMEM-resident across layers.
        out_specs=pl.BlockSpec((b_blk * S, D), lambda bb, l: (bb, 0)),
        compiler_params=pltpu.CompilerParams(
            dimension_semantics=("parallel", "arbitrary"),
            vmem_limit_bytes=_vmem_limit_bytes(b_blk, S, D, F)),
    )(*args)
    return out.reshape(B, S, D)


# --------------------------- params / reference --------------------------


def init_layer_params(key, d_model, d_ff):
    ks = jax.random.split(key, 6)
    s = 1.0 / math.sqrt(d_model)
    sf = 1.0 / math.sqrt(d_ff)
    return {
        "wq": jax.random.normal(ks[0], (d_model, d_model), jnp.float32) * s,
        "wk": jax.random.normal(ks[1], (d_model, d_model), jnp.float32) * s,
        "wv": jax.random.normal(ks[2], (d_model, d_model), jnp.float32) * s,
        "wo": jax.random.normal(ks[3], (d_model, d_model), jnp.float32) * s,
        "ln1_g": jnp.ones((1, d_model), jnp.float32),
        "ln1_b": jnp.zeros((1, d_model), jnp.float32),
        "w1": jax.random.normal(ks[4], (d_model, d_ff), jnp.float32) * s,
        "b1": jnp.zeros((1, d_ff), jnp.float32),
        "w2": jax.random.normal(ks[5], (d_ff, d_model), jnp.float32) * sf,
        "b2": jnp.zeros((1, d_model), jnp.float32),
        "ln2_g": jnp.ones((1, d_model), jnp.float32),
        "ln2_b": jnp.zeros((1, d_model), jnp.float32),
    }


def stack_and_cast(layer_params, d_model):
    """Stack per-layer params along L; fold 1/sqrt(D) into wq; weights -> bf16."""
    stacked = {k: jnp.stack([p[k] for p in layer_params], axis=0)
               for k in layer_params[0]}
    stacked["wq"] = stacked["wq"] * (1.0 / math.sqrt(float(d_model)))
    for k in ("wq", "wk", "wv", "wo", "w1", "w2"):
        stacked[k] = stacked[k].astype(jnp.bfloat16)
    return stacked


def encoder_reference(x, attn_mask, adj_mats, layer_params, norm_params):
    """Pure-JAX reference with the same bf16 matmul operand boundaries."""
    bias = attn_mask + adj_mats

    def ln(h, g, b, eps=1e-5):
        mu = h.mean(-1, keepdims=True)
        var = ((h - mu) ** 2).mean(-1, keepdims=True)
        return (h - mu) * jax.lax.rsqrt(var + eps) * g + b

    bf = jnp.bfloat16
    B, S, D = x.shape
    for p in layer_params:
        h = ln(x, p["ln1_g"], p["ln1_b"])
        q = jnp.einsum("bsd,de->bse", h.astype(bf), p["wq"].astype(bf),
                       preferred_element_type=jnp.float32)
        k = jnp.einsum("bsd,de->bse", h.astype(bf), p["wk"].astype(bf),
                       preferred_element_type=jnp.float32)
        v = jnp.einsum("bsd,de->bse", h.astype(bf), p["wv"].astype(bf),
                       preferred_element_type=jnp.float32)
        s = jnp.einsum("bqd,bkd->bqk", q.astype(bf), k.astype(bf),
                       preferred_element_type=jnp.float32) / math.sqrt(D) + bias
        pa = jax.nn.softmax(s, axis=-1)
        attn = jnp.einsum("bqk,bkd->bqd", pa.astype(bf), v.astype(bf),
                          preferred_element_type=jnp.float32)
        x = x + jnp.einsum("bsd,de->bse", attn.astype(bf), p["wo"].astype(bf),
                           preferred_element_type=jnp.float32)
        h2 = ln(x, p["ln2_g"], p["ln2_b"])
        f = jnp.einsum("bsd,df->bsf", h2.astype(bf), p["w1"].astype(bf),
                       preferred_element_type=jnp.float32) + p["b1"]
        f = jnp.maximum(f, 0.0)
        f = jnp.einsum("bsf,fd->bsd", f.astype(bf), p["w2"].astype(bf),
                       preferred_element_type=jnp.float32) + p["b2"]
        x = x + f
    if norm_params is not None:
        x = ln(x, norm_params["g"], norm_params["b"])
    return x


# ------------------------------ main -------------------------------------

if __name__ == "__main__":
    B, S, D, F = 2, 8, 32, 64
    N_LAYERS = 2

    key = jax.random.PRNGKey(0)
    k_x, k_adj, k_l0, k_l1 = jax.random.split(key, 4)

    x = jax.random.normal(k_x, (B, S, D), jnp.float32)

    # additive attention mask: mask out the last 2 positions (as keys)
    attn_mask = jnp.zeros((B, S, S), jnp.float32)
    attn_mask = attn_mask.at[:, :, S - 2:].set(-1e9)

    # adjacency matrices used as an additive attention bias
    # TODO(synk): real layers may consume a stack of adjacency mats per relation
    adj_mats = (jax.random.uniform(k_adj, (B, S, S)) > 0.5).astype(jnp.float32)

    layer_params = [init_layer_params(k, D, F) for k in (k_l0, k_l1)]
    norm_params = {"g": jnp.ones((1, D), jnp.float32),
                   "b": jnp.zeros((1, D), jnp.float32)}

    stacked = stack_and_cast(layer_params, D)

    out = encoder_forward(x, attn_mask, adj_mats, stacked, norm_params)
    out = jax.block_until_ready(out)

    ref = encoder_reference(x, attn_mask, adj_mats, layer_params, norm_params)

    assert out.shape == (B, S, D) and out.dtype == jnp.float32
    assert bool(jnp.all(jnp.isfinite(out)))
    assert bool(jnp.allclose(out, ref, atol=2e-2, rtol=2e-2)), \
        float(jnp.max(jnp.abs(out - ref)))
    print("KERNEL_OK")
</pallas_src>

<mosaic_0001>
module attributes {stable_mosaic.version = 11 : i64} {
  func.func @kernel(%arg0: i32, %arg1: i32, %arg2: memref<8x32xf32, #tpu.memory_space<vmem>>, %arg3: memref<1x8x8xbf16, #tpu.memory_space<vmem>>, %arg4: memref<1x32x32xbf16, #tpu.memory_space<vmem>>, %arg5: memref<1x32x32xbf16, #tpu.memory_space<vmem>>, %arg6: memref<1x32x32xbf16, #tpu.memory_space<vmem>>, %arg7: memref<1x32x32xbf16, #tpu.memory_space<vmem>>, %arg8: memref<1x1x32xf32, #tpu.memory_space<vmem>>, %arg9: memref<1x1x32xf32, #tpu.memory_space<vmem>>, %arg10: memref<1x32x64xbf16, #tpu.memory_space<vmem>>, %arg11: memref<1x1x64xf32, #tpu.memory_space<vmem>>, %arg12: memref<1x64x32xbf16, #tpu.memory_space<vmem>>, %arg13: memref<1x1x32xf32, #tpu.memory_space<vmem>>, %arg14: memref<1x1x32xf32, #tpu.memory_space<vmem>>, %arg15: memref<1x1x32xf32, #tpu.memory_space<vmem>>, %arg16: memref<1x32xf32, #tpu.memory_space<vmem>>, %arg17: memref<1x32xf32, #tpu.memory_space<vmem>>, %arg18: memref<8x32xf32, #tpu.memory_space<vmem>>) attributes {dimension_semantics = [#tpu.dimension_semantics<parallel>, #tpu.dimension_semantics<arbitrary>], iteration_bounds = array<i64: 2, 2>, scalar_prefetch = 0 : i64, scratch_operands = 0 : i64, tpu.core_type = #tpu.core_type<tc>, window_params = [{transform_indices = @transform_0, window_bounds = array<i64: 8, 32>}, {transform_indices = @transform_1, window_bounds = array<i64: 1, 8, 8>}, {transform_indices = @transform_2, window_bounds = array<i64: 1, 32, 32>}, {transform_indices = @transform_3, window_bounds = array<i64: 1, 32, 32>}, {transform_indices = @transform_4, window_bounds = array<i64: 1, 32, 32>}, {transform_indices = @transform_5, window_bounds = array<i64: 1, 32, 32>}, {transform_indices = @transform_6, window_bounds = array<i64: 1, 1, 32>}, {transform_indices = @transform_7, window_bounds = array<i64: 1, 1, 32>}, {transform_indices = @transform_8, window_bounds = array<i64: 1, 32, 64>}, {transform_indices = @transform_9, window_bounds = array<i64: 1, 1, 64>}, {transform_indices = @transform_10, window_bounds = array<i64: 1, 64, 32>}, {transform_indices = @transform_11, window_bounds = array<i64: 1, 1, 32>}, {transform_indices = @transform_12, window_bounds = array<i64: 1, 1, 32>}, {transform_indices = @transform_13, window_bounds = array<i64: 1, 1, 32>}, {pipeline_mode = #tpu.pipeline_mode<synchronous>, transform_indices = @transform_14, window_bounds = array<i64: 1, 32>}, {pipeline_mode = #tpu.pipeline_mode<synchronous>, transform_indices = @transform_15, window_bounds = array<i64: 1, 32>}, {transform_indices = @transform_16, window_bounds = array<i64: 8, 32>}]} {
    %c0_i32 = arith.constant 0 : i32
    %0 = arith.cmpi eq, %arg1, %c0_i32 : i32
    %1 = arith.extui %0 : i1 to i32
    %c0_i32_0 = arith.constant 0 : i32
    %2 = arith.cmpi ne, %1, %c0_i32_0 : i32
    scf.if %2 {
      %c0_64 = arith.constant 0 : index
      %c0_65 = arith.constant 0 : index
      %119 = vector.load %arg2[%c0_64, %c0_65] : memref<8x32xf32, #tpu.memory_space<vmem>>, vector<8x32xf32>
      %c0_66 = arith.constant 0 : index
      %c0_67 = arith.constant 0 : index
      %120 = vector.load %arg18[%c0_66, %c0_67] : memref<8x32xf32, #tpu.memory_space<vmem>>, vector<8x32xf32>
      tpu.vector_store %arg18[%c0_66, %c0_67], %119 {strides = array<i32>} : memref<8x32xf32, #tpu.memory_space<vmem>>, vector<8x32xf32>,
    } else {
    }
    %c0 = arith.constant 0 : index
    %c0_1 = arith.constant 0 : index
    %3 = vector.load %arg18[%c0, %c0_1] : memref<8x32xf32, #tpu.memory_space<vmem>>, vector<8x32xf32>
    %c0_2 = arith.constant 0 : index
    %c0_3 = arith.constant 0 : index
    %c0_4 = arith.constant 0 : index
    %4 = vector.load %arg8[%c0_2, %c0_3, %c0_4] : memref<1x1x32xf32, #tpu.memory_space<vmem>>, vector<1x1x32xf32>
    %5 = vector.shape_cast %4 : vector<1x1x32xf32> to vector<1x32xf32>
    %c0_5 = arith.constant 0 : index
    %c0_6 = arith.constant 0 : index
    %c0_7 = arith.constant 0 : index
    %6 = vector.load %arg9[%c0_5, %c0_6, %c0_7] : memref<1x1x32xf32, #tpu.memory_space<vmem>>, vector<1x1x32xf32>
    %7 = vector.shape_cast %6 : vector<1x1x32xf32> to vector<1x32xf32>
    %cst = arith.constant dense<0.000000e+00> : vector<8xf32>
    %8 = vector.multi_reduction <add>, %3, %cst [1] : vector<8x32xf32> to vector<8xf32>
    %9 = vector.shape_cast %8 : vector<8xf32> to vector<8x1xf32>
    %cst_8 = arith.constant 3.200000e+01 : f32
    %10 = vector.broadcast %cst_8 : f32 to vector<8x1xf32>
    %11 = arith.divf %9, %10 : vector<8x1xf32>
    %12 = vector.broadcast %11 : vector<8x1xf32> to vector<8x32xf32>
    %13 = arith.subf %3, %12 : vector<8x32xf32>
    %14 = arith.mulf %13, %13 : vector<8x32xf32>
    %cst_9 = arith.constant dense<0.000000e+00> : vector<8xf32>
    %15 = vector.multi_reduction <add>, %14, %cst_9 [1] : vector<8x32xf32> to vector<8xf32>
    %16 = vector.shape_cast %15 : vector<8xf32> to vector<8x1xf32>
    %cst_10 = arith.constant 3.200000e+01 : f32
    %17 = vector.broadcast %cst_10 : f32 to vector<8x1xf32>
    %18 = arith.divf %16, %17 : vector<8x1xf32>
    %19 = vector.broadcast %11 : vector<8x1xf32> to vector<8x32xf32>
    %20 = arith.subf %3, %19 : vector<8x32xf32>
    %cst_11 = arith.constant 9.99999974E-6 : f32
    %21 = vector.broadcast %cst_11 : f32 to vector<8x1xf32>
    %22 = arith.addf %18, %21 : vector<8x1xf32>
    %23 = math.rsqrt %22 : vector<8x1xf32>
    %24 = vector.broadcast %23 : vector<8x1xf32> to vector<8x32xf32>
    %25 = arith.mulf %20, %24 : vector<8x32xf32>
    %26 = vector.broadcast %5 : vector<1x32xf32> to vector<8x32xf32>
    %27 = arith.mulf %25, %26 : vector<8x32xf32>
    %28 = vector.broadcast %7 : vector<1x32xf32> to vector<8x32xf32>
    %29 = arith.addf %27, %28 : vector<8x32xf32>
    %30 = arith.truncf %29 : vector<8x32xf32> to vector<8x32xbf16>
    %c0_12 = arith.constant 0 : index
    %c0_13 = arith.constant 0 : index
    %c0_14 = arith.constant 0 : index
    %31 = vector.load %arg4[%c0_12, %c0_13, %c0_14] : memref<1x32x32xbf16, #tpu.memory_space<vmem>>, vector<1x32x32xbf16>
    %32 = vector.shape_cast %31 : vector<1x32x32xbf16> to vector<32x32xbf16>
    %cst_15 = arith.constant dense<0.000000e+00> : vector<8x32xf32>
    %33 = tpu.matmul %30, %32, %cst_15 {dimension_numbers = #tpu.dot_dimension_numbers<[1], [0], [0], [1], [0, 0, 1, 1], [], []>} : vector<8x32xbf16>, vector<32x32xbf16>, vector<8x32xf32> -> vector<8x32xf32>
    %c0_16 = arith.constant 0 : index
    %c0_17 = arith.constant 0 : index
    %c0_18 = arith.constant 0 : index
    %34 = vector.load %arg5[%c0_16, %c0_17, %c0_18] : memref<1x32x32xbf16, #tpu.memory_space<vmem>>, vector<1x32x32xbf16>
    %35 = vector.shape_cast %34 : vector<1x32x32xbf16> to vector<32x32xbf16>
    %cst_19 = arith.constant dense<0.000000e+00> : vector<8x32xf32>
    %36 = tpu.matmul %30, %35, %cst_19 {dimension_numbers = #tpu.dot_dimension_numbers<[1], [0], [0], [1], [0, 0, 1, 1], [], []>} : vector<8x32xbf16>, vector<32x32xbf16>, vector<8x32xf32> -> vector<8x32xf32>
    %c0_20 = arith.constant 0 : index
    %c0_21 = arith.constant 0 : index
    %c0_22 = arith.constant 0 : index
    %37 = vector.load %arg6[%c0_20, %c0_21, %c0_22] : memref<1x32x32xbf16, #tpu.memory_space<vmem>>, vector<1x32x32xbf16>
    %38 = vector.shape_cast %37 : vector<1x32x32xbf16> to vector<32x32xbf16>
    %cst_23 = arith.constant dense<0.000000e+00> : vector<8x32xf32>
    %39 = tpu.matmul %30, %38, %cst_23 {dimension_numbers = #tpu.dot_dimension_numbers<[1], [0], [0], [1], [0, 0, 1, 1], [], []>} : vector<8x32xbf16>, vector<32x32xbf16>, vector<8x32xf32> -> vector<8x32xf32>
    %40 = vector.shape_cast %33 : vector<8x32xf32> to vector<1x8x32xf32>
    %41 = vector.shape_cast %36 : vector<8x32xf32> to vector<1x8x32xf32>
    %42 = vector.shape_cast %39 : vector<8x32xf32> to vector<1x8x32xf32>
    %43 = arith.truncf %40 : vector<1x8x32xf32> to vector<1x8x32xbf16>
    %44 = arith.truncf %41 : vector<1x8x32xf32> to vector<1x8x32xbf16>
    "tpu.trace_start"() <{level = 10 : i32, message = "bqd,bkd->bqk"}> : () -> ()
    %cst_24 = arith.constant dense<0.000000e+00> : vector<1x8x8xf32>
    %45 = tpu.matmul %43, %44, %cst_24 {dimension_numbers = #tpu.dot_dimension_numbers<[2], [2], [1], [1], [0, 0, 0, 1, 1, 1], [0], [0]>} : vector<1x8x32xbf16>, vector<1x8x32xbf16>, vector<1x8x8xf32> -> vector<1x8x8xf32>
    "tpu.trace_stop"() : () -> ()
    %c0_25 = arith.constant 0 : index
    %c0_26 = arith.constant 0 : index
    %c0_27 = arith.constant 0 : index
    %46 = vector.load %arg3[%c0_25, %c0_26, %c0_27] : memref<1x8x8xbf16, #tpu.memory_space<vmem>>, vector<1x8x8xbf16>
    %47 = arith.extf %46 : vector<1x8x8xbf16> to vector<1x8x8xf32>
    %48 = arith.addf %45, %47 : vector<1x8x8xf32>
    %cst_28 = arith.constant dense<0xFF800000> : vector<1x8xf32>
    %49 = vector.multi_reduction <maximumf>, %48, %cst_28 [2] : vector<1x8x8xf32> to vector<1x8xf32>
    %50 = vector.shape_cast %49 : vector<1x8xf32> to vector<1x8x1xf32>
    %51 = vector.broadcast %50 : vector<1x8x1xf32> to vector<1x8x8xf32>
    %52 = arith.subf %48, %51 : vector<1x8x8xf32>
    %53 = math.exp %52 : vector<1x8x8xf32>
    %cst_29 = arith.constant dense<0.000000e+00> : vector<1x8xf32>
    %54 = vector.multi_reduction <add>, %53, %cst_29 [2] : vector<1x8x8xf32> to vector<1x8xf32>
    %55 = vector.shape_cast %54 : vector<1x8xf32> to vector<1x8x1xf32>
    %56 = arith.truncf %53 : vector<1x8x8xf32> to vector<1x8x8xbf16>
    %57 = tpu.reciprocal %55 {approx = true} : vector<1x8x1xf32> -> vector<1x8x1xf32>
    %58 = arith.truncf %42 : vector<1x8x32xf32> to vector<1x8x32xbf16>
    "tpu.trace_start"() <{level = 10 : i32, message = "bqk,bkd->bqd"}> : () -> ()
    %cst_30 = arith.constant dense<0.000000e+00> : vector<1x8x32xf32>
    %59 = tpu.matmul %56, %58, %cst_30 {dimension_numbers = #tpu.dot_dimension_numbers<[2], [1], [1], [2], [0, 0, 0, 1, 1, 2], [0], [0]>} : vector<1x8x8xbf16>, vector<1x8x32xbf16>, vector<1x8x32xf32> -> vector<1x8x32xf32>
    "tpu.trace_stop"() : () -> ()
    %60 = vector.broadcast %57 : vector<1x8x1xf32> to vector<1x8x32xf32>
    %61 = arith.mulf %59, %60 : vector<1x8x32xf32>
    %62 = vector.shape_cast %61 : vector<1x8x32xf32> to vector<8x32xf32>
    %63 = arith.truncf %62 : vector<8x32xf32> to vector<8x32xbf16>
    %c0_31 = arith.constant 0 : index
    %c0_32 = arith.constant 0 : index
    %c0_33 = arith.constant 0 : index
    %64 = vector.load %arg7[%c0_31, %c0_32, %c0_33] : memref<1x32x32xbf16, #tpu.memory_space<vmem>>, vector<1x32x32xbf16>
    %65 = vector.shape_cast %64 : vector<1x32x32xbf16> to vector<32x32xbf16>
    %cst_34 = arith.constant dense<0.000000e+00> : vector<8x32xf32>
    %66 = tpu.matmul %63, %65, %cst_34 {dimension_numbers = #tpu.dot_dimension_numbers<[1], [0], [0], [1], [0, 0, 1, 1], [], []>} : vector<8x32xbf16>, vector<32x32xbf16>, vector<8x32xf32> -> vector<8x32xf32>
    %67 = arith.addf %3, %66 : vector<8x32xf32>
    %c0_35 = arith.constant 0 : index
    %c0_36 = arith.constant 0 : index
    %c0_37 = arith.constant 0 : index
    %68 = vector.load %arg14[%c0_35, %c0_36, %c0_37] : memref<1x1x32xf32, #tpu.memory_space<vmem>>, vector<1x1x32xf32>
    %69 = vector.shape_cast %68 : vector<1x1x32xf32> to vector<1x32xf32>
    %c0_38 = arith.constant 0 : index
    %c0_39 = arith.constant 0 : index
    %c0_40 = arith.constant 0 : index
    %70 = vector.load %arg15[%c0_38, %c0_39, %c0_40] : memref<1x1x32xf32, #tpu.memory_space<vmem>>, vector<1x1x32xf32>
    %71 = vector.shape_cast %70 : vector<1x1x32xf32> to vector<1x32xf32>
    %cst_41 = arith.constant dense<0.000000e+00> : vector<8xf32>
    %72 = vector.multi_reduction <add>, %67, %cst_41 [1] : vector<8x32xf32> to vector<8xf32>
    %73 = vector.shape_cast %72 : vector<8xf32> to vector<8x1xf32>
    %cst_42 = arith.constant 3.200000e+01 : f32
    %74 = vector.broadcast %cst_42 : f32 to vector<8x1xf32>
    %75 = arith.divf %73, %74 : vector<8x1xf32>
    %76 = vector.broadcast %75 : vector<8x1xf32> to vector<8x32xf32>
    %77 = arith.subf %67, %76 : vector<8x32xf32>
    %78 = arith.mulf %77, %77 : vector<8x32xf32>
    %cst_43 = arith.constant dense<0.000000e+00> : vector<8xf32>
    %79 = vector.multi_reduction <add>, %78, %cst_43 [1] : vector<8x32xf32> to vector<8xf32>
    %80 = vector.shape_cast %79 : vector<8xf32> to vector<8x1xf32>
    %cst_44 = arith.constant 3.200000e+01 : f32
    %81 = vector.broadcast %cst_44 : f32 to vector<8x1xf32>
    %82 = arith.divf %80, %81 : vector<8x1xf32>
    %83 = vector.broadcast %75 : vector<8x1xf32> to vector<8x32xf32>
    %84 = arith.subf %67, %83 : vector<8x32xf32>
    %cst_45 = arith.constant 9.99999974E-6 : f32
    %85 = vector.broadcast %cst_45 : f32 to vector<8x1xf32>
    %86 = arith.addf %82, %85 : vector<8x1xf32>
    %87 = math.rsqrt %86 : vector<8x1xf32>
    %88 = vector.broadcast %87 : vector<8x1xf32> to vector<8x32xf32>
    %89 = arith.mulf %84, %88 : vector<8x32xf32>
    %90 = vector.broadcast %69 : vector<1x32xf32> to vector<8x32xf32>
    %91 = arith.mulf %89, %90 : vector<8x32xf32>
    %92 = vector.broadcast %71 : vector<1x32xf32> to vector<8x32xf32>
    %93 = arith.addf %91, %92 : vector<8x32xf32>
    %94 = arith.truncf %93 : vector<8x32xf32> to vector<8x32xbf16>
    %c0_46 = arith.constant 0 : index
    %c0_47 = arith.constant 0 : index
    %c0_48 = arith.constant 0 : index
    %95 = vector.load %arg10[%c0_46, %c0_47, %c0_48] : memref<1x32x64xbf16, #tpu.memory_space<vmem>>, vector<1x32x64xbf16>
    %96 = vector.shape_cast %95 : vector<1x32x64xbf16> to vector<32x64xbf16>
    %cst_49 = arith.constant dense<0.000000e+00> : vector<8x64xf32>
    %97 = tpu.matmul %94, %96, %cst_49 {dimension_numbers = #tpu.dot_dimension_numbers<[1], [0], [0], [1], [0, 0, 1, 1], [], []>} : vector<8x32xbf16>, vector<32x64xbf16>, vector<8x64xf32> -> vector<8x64xf32>
    %c0_50 = arith.constant 0 : index
    %c0_51 = arith.constant 0 : index
    %c0_52 = arith.constant 0 : index
    %98 = vector.load %arg11[%c0_50, %c0_51, %c0_52] : memref<1x1x64xf32, #tpu.memory_space<vmem>>, vector<1x1x64xf32>
    %99 = vector.shape_cast %98 : vector<1x1x64xf32> to vector<1x64xf32>
    %100 = vector.broadcast %99 : vector<1x64xf32> to vector<8x64xf32>
    %101 = arith.addf %97, %100 : vector<8x64xf32>
    %cst_53 = arith.constant 0.000000e+00 : f32
    %102 = vector.broadcast %cst_53 : f32 to vector<8x64xf32>
    %103 = arith.maximumf %101, %102 : vector<8x64xf32>
    %104 = arith.truncf %103 : vector<8x64xf32> to vector<8x64xbf16>
    %c0_54 = arith.constant 0 : index
    %c0_55 = arith.constant 0 : index
    %c0_56 = arith.constant 0 : index
    %105 = vector.load %arg12[%c0_54, %c0_55, %c0_56] : memref<1x64x32xbf16, #tpu.memory_space<vmem>>, vector<1x64x32xbf16>
    %106 = vector.shape_cast %105 : vector<1x64x32xbf16> to vector<64x32xbf16>
    %cst_57 = arith.constant dense<0.000000e+00> : vector<8x32xf32>
    %107 = tpu.matmul %104, %106, %cst_57 {dimension_numbers = #tpu.dot_dimension_numbers<[1], [0], [0], [1], [0, 0, 1, 1], [], []>} : vector<8x64xbf16>, vector<64x32xbf16>, vector<8x32xf32> -> vector<8x32xf32>
    %c0_58 = arith.constant 0 : index
    %c0_59 = arith.constant 0 : index
    %c0_60 = arith.constant 0 : index
    %108 = vector.load %arg13[%c0_58, %c0_59, %c0_60] : memref<1x1x32xf32, #tpu.memory_space<vmem>>, vector<1x1x32xf32>
    %109 = vector.shape_cast %108 : vector<1x1x32xf32> to vector<1x32xf32>
    %110 = vector.broadcast %109 : vector<1x32xf32> to vector<8x32xf32>
    %111 = arith.addf %107, %110 : vector<8x32xf32>
    %112 = arith.addf %67, %111 : vector<8x32xf32>
    %c1_i32 = arith.constant 1 : i32
    %113 = arith.cmpi eq, %arg1, %c1_i32 : i32
    %114 = arith.extui %113 : i1 to i32
    %c0_i32_61 = arith.constant 0 : i32
    %115 = arith.cmpi ne, %114, %c0_i32_61 : i32
    scf.if %115 {
      %c0_64 = arith.constant 0 : index
      %c0_65 = arith.constant 0 : index
      %119 = vector.load %arg16[%c0_64, %c0_65] : memref<1x32xf32, #tpu.memory_space<vmem>>, vector<1x32xf32>
      %c0_66 = arith.constant 0 : index
      %c0_67 = arith.constant 0 : index
      %120 = vector.load %arg17[%c0_66, %c0_67] : memref<1x32xf32, #tpu.memory_space<vmem>>, vector<1x32xf32>
      %cst_68 = arith.constant dense<0.000000e+00> : vector<8xf32>
      %121 = vector.multi_reduction <add>, %112, %cst_68 [1] : vector<8x32xf32> to vector<8xf32>
      %122 = vector.shape_cast %121 : vector<8xf32> to vector<8x1xf32>
      %cst_69 = arith.constant 3.200000e+01 : f32
      %123 = vector.broadcast %cst_69 : f32 to vector<8x1xf32>
      %124 = arith.divf %122, %123 : vector<8x1xf32>
      %125 = vector.broadcast %124 : vector<8x1xf32> to vector<8x32xf32>
      %126 = arith.subf %112, %125 : vector<8x32xf32>
      %127 = arith.mulf %126, %126 : vector<8x32xf32>
      %cst_70 = arith.constant dense<0.000000e+00> : vector<8xf32>
      %128 = vector.multi_reduction <add>, %127, %cst_70 [1] : vector<8x32xf32> to vector<8xf32>
      %129 = vector.shape_cast %128 : vector<8xf32> to vector<8x1xf32>
      %cst_71 = arith.constant 3.200000e+01 : f32
      %130 = vector.broadcast %cst_71 : f32 to vector<8x1xf32>
      %131 = arith.divf %129, %130 : vector<8x1xf32>
      %132 = vector.broadcast %124 : vector<8x1xf32> to vector<8x32xf32>
      %133 = arith.subf %112, %132 : vector<8x32xf32>
      %cst_72 = arith.constant 9.99999974E-6 : f32
      %134 = vector.broadcast %cst_72 : f32 to vector<8x1xf32>
      %135 = arith.addf %131, %134 : vector<8x1xf32>
      %136 = math.rsqrt %135 : vector<8x1xf32>
      %137 = vector.broadcast %136 : vector<8x1xf32> to vector<8x32xf32>
      %138 = arith.mulf %133, %137 : vector<8x32xf32>
      %139 = vector.broadcast %119 : vector<1x32xf32> to vector<8x32xf32>
      %140 = arith.mulf %138, %139 : vector<8x32xf32>
      %141 = vector.broadcast %120 : vector<1x32xf32> to vector<8x32xf32>
      %142 = arith.addf %140, %141 : vector<8x32xf32>
      %c0_73 = arith.constant 0 : index
      %c0_74 = arith.constant 0 : index
      %143 = vector.load %arg18[%c0_73, %c0_74] : memref<8x32xf32, #tpu.memory_space<vmem>>, vector<8x32xf32>
      tpu.vector_store %arg18[%c0_73, %c0_74], %142 {strides = array<i32>} : memref<8x32xf32, #tpu.memory_space<vmem>>, vector<8x32xf32>,
    } else {
    }
    %c1_i32_62 = arith.constant 1 : i32
    %116 = arith.cmpi ne, %arg1, %c1_i32_62 : i32
    %117 = arith.extui %116 : i1 to i32
    %c0_i32_63 = arith.constant 0 : i32
    %118 = arith.cmpi ne, %117, %c0_i32_63 : i32
    scf.if %118 {
      %c0_64 = arith.constant 0 : index
      %c0_65 = arith.constant 0 : index
      %119 = vector.load %arg18[%c0_64, %c0_65] : memref<8x32xf32, #tpu.memory_space<vmem>>, vector<8x32xf32>
      tpu.vector_store %arg18[%c0_64, %c0_65], %112 {strides = array<i32>} : memref<8x32xf32, #tpu.memory_space<vmem>>, vector<8x32xf32>,
    } else {
    }
    return
  }
  func.func @transform_0(%arg0: i32, %arg1: i32) -> (i32, i32) {
    %c0_i32 = arith.constant 0 : i32
    %c0_i32_0 = arith.constant 0 : i32
    return %arg0, %c0_i32 : i32, i32
  }
  func.func @transform_1(%arg0: i32, %arg1: i32) -> (i32, i32, i32) {
    %c0_i32 = arith.constant 0 : i32
    %c0_i32_0 = arith.constant 0 : i32
    %c0_i32_1 = arith.constant 0 : i32
    return %arg0, %c0_i32, %c0_i32_0 : i32, i32, i32
  }
  func.func @transform_2(%arg0: i32, %arg1: i32) -> (i32, i32, i32) {
    %c0_i32 = arith.constant 0 : i32
    %c0_i32_0 = arith.constant 0 : i32
    %c0_i32_1 = arith.constant 0 : i32
    return %arg1, %c0_i32, %c0_i32_0 : i32, i32, i32
  }
  func.func @transform_3(%arg0: i32, %arg1: i32) -> (i32, i32, i32) {
    %c0_i32 = arith.constant 0 : i32
    %c0_i32_0 = arith.constant 0 : i32
    %c0_i32_1 = arith.constant 0 : i32
    return %arg1, %c0_i32, %c0_i32_0 : i32, i32, i32
  }
  func.func @transform_4(%arg0: i32, %arg1: i32) -> (i32, i32, i32) {
    %c0_i32 = arith.constant 0 : i32
    %c0_i32_0 = arith.constant 0 : i32
    %c0_i32_1 = arith.constant 0 : i32
    return %arg1, %c0_i32, %c0_i32_0 : i32, i32, i32
  }
  func.func @transform_5(%arg0: i32, %arg1: i32) -> (i32, i32, i32) {
    %c0_i32 = arith.constant 0 : i32
    %c0_i32_0 = arith.constant 0 : i32
    %c0_i32_1 = arith.constant 0 : i32
    return %arg1, %c0_i32, %c0_i32_0 : i32, i32, i32
  }
  func.func @transform_6(%arg0: i32, %arg1: i32) -> (i32, i32, i32) {
    %c0_i32 = arith.constant 0 : i32
    %c0_i32_0 = arith.constant 0 : i32
    %c0_i32_1 = arith.constant 0 : i32
    return %arg1, %c0_i32, %c0_i32_0 : i32, i32, i32
  }
  func.func @transform_7(%arg0: i32, %arg1: i32) -> (i32, i32, i32) {
    %c0_i32 = arith.constant 0 : i32
    %c0_i32_0 = arith.constant 0 : i32
    %c0_i32_1 = arith.constant 0 : i32
    return %arg1, %c0_i32, %c0_i32_0 : i32, i32, i32
  }
  func.func @transform_8(%arg0: i32, %arg1: i32) -> (i32, i32, i32) {
    %c0_i32 = arith.constant 0 : i32
    %c0_i32_0 = arith.constant 0 : i32
    %c0_i32_1 = arith.constant 0 : i32
    return %arg1, %c0_i32, %c0_i32_0 : i32, i32, i32
  }
  func.func @transform_9(%arg0: i32, %arg1: i32) -> (i32, i32, i32) {
    %c0_i32 = arith.constant 0 : i32
    %c0_i32_0 = arith.constant 0 : i32
    %c0_i32_1 = arith.constant 0 : i32
    return %arg1, %c0_i32, %c0_i32_0 : i32, i32, i32
  }
  func.func @transform_10(%arg0: i32, %arg1: i32) -> (i32, i32, i32) {
    %c0_i32 = arith.constant 0 : i32
    %c0_i32_0 = arith.constant 0 : i32
    %c0_i32_1 = arith.constant 0 : i32
    return %arg1, %c0_i32, %c0_i32_0 : i32, i32, i32
  }
  func.func @transform_11(%arg0: i32, %arg1: i32) -> (i32, i32, i32) {
    %c0_i32 = arith.constant 0 : i32
    %c0_i32_0 = arith.constant 0 : i32
    %c0_i32_1 = arith.constant 0 : i32
    return %arg1, %c0_i32, %c0_i32_0 : i32, i32, i32
  }
  func.func @transform_12(%arg0: i32, %arg1: i32) -> (i32, i32, i32) {
    %c0_i32 = arith.constant 0 : i32
    %c0_i32_0 = arith.constant 0 : i32
    %c0_i32_1 = arith.constant 0 : i32
    return %arg1, %c0_i32, %c0_i32_0 : i32, i32, i32
  }
  func.func @transform_13(%arg0: i32, %arg1: i32) -> (i32, i32, i32) {
    %c0_i32 = arith.constant 0 : i32
    %c0_i32_0 = arith.constant 0 : i32
    %c0_i32_1 = arith.constant 0 : i32
    return %arg1, %c0_i32, %c0_i32_0 : i32, i32, i32
  }
  func.func @transform_14(%arg0: i32, %arg1: i32) -> (i32, i32) {
    %c0_i32 = arith.constant 0 : i32
    %c0_i32_0 = arith.constant 0 : i32
    %c0_i32_1 = arith.constant 0 : i32
    return %c0_i32, %c0_i32_0 : i32, i32
  }
  func.func @transform_15(%arg0: i32, %arg1: i32) -> (i32, i32) {
    %c0_i32 = arith.constant 0 : i32
    %c0_i32_0 = arith.constant 0 : i32
    %c0_i32_1 = arith.constant 0 : i32
    return %c0_i32, %c0_i32_0 : i32, i32
  }
  func.func @transform_16(%arg0: i32, %arg1: i32) -> (i32, i32) {
    %c0_i32 = arith.constant 0 : i32
    %c0_i32_0 = arith.constant 0 : i32
    return %arg0, %c0_i32 : i32, i32
  }
}

</mosaic_0001>

<bundles_post_ra>
// kernel: tpu_custom_call.1
= control target key start
LH: loop header
LB: loop body
LE: loop exit
PB: predicated region body
PF: predicated region fallthrough
CT: control target
= control target key end

     0   :  { %s2980_s0 = inlined_call_operand.hbm [shape: f32[16,32], index: 0, kind: input, shape index: {}]   ;;  %s2981_s1 = inlined_call_operand.hbm [shape: bf16[2,8,8], index: 1, kind: input, shape index: {}]   ;;  %s2982_s2 = inlined_call_operand.vmem [shape: bf16[2,32,32], index: 2, kind: input, shape index: {}]   ;;  %s2983_s3 = inlined_call_operand.vmem [shape: bf16[2,32,32], index: 3, kind: input, shape index: {}]   ;;  %s2984_s4 = inlined_call_operand.vmem [shape: bf16[2,32,32], index: 4, kind: input, shape index: {}]   ;;  %s2985_s5 = inlined_call_operand.hbm [shape: bf16[2,32,32], index: 5, kind: input, shape index: {}]   ;;  %s2986_s6 = inlined_call_operand.vmem [shape: f32[2,1,32], index: 6, kind: input, shape index: {}]   ;;  %s2987_s7 = inlined_call_operand.vmem [shape: f32[2,1,32], index: 7, kind: input, shape index: {}]   ;;  %s2988_s8 = inlined_call_operand.hbm [shape: bf16[2,32,64], index: 8, kind: input, shape index: {}]   ;;  %s2989_s9 = inlined_call_operand.hbm [shape: f32[2,1,64], index: 9, kind: input, shape index: {}]   ;;  %s2990_s10 = inlined_call_operand.vmem [shape: bf16[2,64,32], index: 10, kind: input, shape index: {}]   ;;  %s2991_s11 = inlined_call_operand.vmem [shape: f32[2,1,32], index: 11, kind: input, shape index: {}]   ;;  %s2992_s12 = inlined_call_operand.vmem [shape: f32[2,1,32], index: 12, kind: input, shape index: {}]   ;;  %s2993_s13 = inlined_call_operand.vmem [shape: f32[2,1,32], index: 13, kind: input, shape index: {}]   ;;  %s2994_s14 = inlined_call_operand.vmem [shape: f32[1,32], index: 14, kind: input, shape index: {}]   ;;  %s2995_s15 = inlined_call_operand.vmem [shape: f32[1,32], index: 15, kind: input, shape index: {}]   ;;  %s2996_s16 = inlined_call_operand.hbm [shape: f32[16,32], index: 16, kind: output, shape index: {}]  }
   0x1   :  { %3029 = sst [smem:[#allocation34_spill]] %s2980_s0 }
   0x2   :  { %3030 = sst [smem:[#allocation35_spill]] %s2981_s1 }
   0x3   :  { %3031 = sst [smem:[#allocation36_spill]] %s2982_s2 }
   0x4   :  { %3032 = sst [smem:[#allocation37_spill]] %s2983_s3 }
   0x5   :  { %3033 = sst [smem:[#allocation38_spill]] %s2984_s4 }
   0x6   :  { %3034 = sst [smem:[#allocation39_spill]] %s2985_s5 }
   0x7   :  { %3035 = sst [smem:[#allocation40_spill]] %s2986_s6 }
   0x8   :  { %3036 = sst [smem:[#allocation41_spill]] %s2987_s7 }
   0x9   :  { %3037 = sst [smem:[#allocation42_spill]] %s2988_s8 }
   0xa   :  { %3038 = sst [smem:[#allocation43_spill]] %s2989_s9 }
   0xb   :  { %3039 = sst [smem:[#allocation44_spill]] %s2990_s10 }
   0xc   :  { %3040 = sst [smem:[#allocation45_spill]] %s2991_s11 }
   0xd   :  { %3041 = sst [smem:[#allocation46_spill]] %s2992_s12 }
   0xe   :  { %3042 = sst [smem:[#allocation47_spill]] %s2993_s13 }
   0xf   :  { %3043 = sst [smem:[#allocation48_spill]] %s2994_s14 }
  0x10   :  { %3044 = sst [smem:[#allocation49_spill]] %s2995_s15 }
  0x11   :  { %3045 = sst [smem:[#allocation50_spill]] %s2996_s16 }
  0x12   :  { %21 = vsyncpa [#allocation3], 0 }
  0x13   :  { %23 = vsyncpa [#allocation3 + $0x1], 0 }
  0x14   :  { %24 = vsyncpa [#allocation6], 0 }
  0x15   :  { %26 = vsyncpa [#allocation6 + $0x1], 0 }
  0x16   :  { %27 = vsyncpa [#allocation9], 0 }
  0x17   :  { %29 = vsyncpa [#allocation9 + $0x1], 0 }
  0x18   :  { %30 = vsyncpa [#allocation4], 0 }
  0x19   :  { %32 = vsyncpa [#allocation4 + $0x1], 0  ;;  %s2411_s21 = smov 0   ;;  %s2413_s22 = smov 0  }
  0x1a   :  { %s2415_s23 = smov 0   ;;  %s2417_s24 = smov 0  }
  0x1b   :  { %s2419_s25 = smov 0   ;;  %s2421_s26 = smov 0  }
  0x1c   :  { %s2423_s27 = smov 0   ;;  %s2425_s28 = smov 0  }
  0x1d   :  { %s2427_s29 = smov 0   ;;  %s2429_s30 = smov 0  }
  0x1e   :  { %s2431_s0 = smov 0  }
  0x1f LB: > { %3046 = sst [smem:[#allocation17_spill]] %s2278_s22  ;;  %s2465_s17 = sadd.s32 4294967295, %s2314_s0   ;;  %s2314_s0 = sphi %s2431_s0, %s38_s0   ;;  %s2310_s30 = sphi %s2429_s30, %s3137_s30   ;;  %s2306_s29 = sphi %s2427_s29, %s3136_s29   ;;  %s2302_s28 = sphi %s2425_s28, %s3135_s28   ;;  %s2298_s27 = sphi %s2423_s27, %s3134_s27   ;;  %s2294_s26 = sphi %s2421_s26, %s3133_s26   ;;  %s2290_s25 = sphi %s2419_s25, %s3132_s25   ;;  %s2286_s24 = sphi %s2417_s24, %s3131_s24   ;;  %s2282_s23 = sphi %s2415_s23, %s3130_s23   ;;  %s2278_s22 = sphi %s2413_s22, %s3129_s22   ;;  %s2274_s21 = sphi %s2411_s21, %s3128_s21  }
  0x20   : > { %3047 = sst [smem:[#allocation18_spill]] %s2282_s23  ;;  %s1721_s18 = sadd.s32 4294967294, %s2314_s0  }
  0x21   : > { %3048 = sst [smem:[#allocation19_spill]] %s2286_s24  ;;  %p64_p0 = scmp.ne.s32.totalorder %s2294_s26, %s2290_s25 }
  0x22   : > { %3049 = sst [smem:[#allocation20_spill]] %s2290_s25  ;;  %p65_p1 = scmp.eq.s32.totalorder %s2314_s0, 0 }
  0x23   : > { %3050 = sst [smem:[#allocation21_spill]] %s2294_s26  ;;  %p70_p2 = scmp.ne.s32.totalorder %s2290_s25, %s2286_s24 }
  0x24   : > { %3051 = sst [smem:[#allocation22_spill]] %s2298_s27  ;;  %p71_p3 = scmp.eq.s32.totalorder %s2465_s17, 0 }
  0x25   : > { %3052 = sst [smem:[#allocation23_spill]] %s2302_s28  ;;  %p2479_p4 = por %p65_p1, %p64_p0 }
  0x26   : > { %3053 = sst [smem:[#allocation24_spill]] %s2306_s29  ;;  %p2484_p5 = por %p71_p3, %p70_p2 }
  0x27   : > { %3054 = sst [smem:[#allocation25_spill]] %s2310_s30  ;;  %p194_p6 = scmp.ne.s32.totalorder %s2282_s23, %s2278_s22 }
  0x28   : > { %3055 = sst [smem:[#allocation26_spill]] %s2314_s0  ;;  %p200_p7 = scmp.ne.s32.totalorder %s2278_s22, %s2274_s21 }
  0x29   : > { %s3057_s15 = scalar_select %p2484_p5, 1, 0 }
  0x2a   : > { %p474_p8 = scmp.eq.s32.totalorder %s2465_s17, 3  ;;  %p2492_p9 = por %p194_p6, %p65_p1 }
  0x2b   : > { %p480_p10 = scmp.eq.s32.totalorder %s1721_s18, 3  ;;  %p2496_p11 = por %p200_p7, %p71_p3 }
  0x2c   : > { %p2503_p12 = por %p474_p8, %p64_p0  ;;  %p1912_p1 = scmp.lt.s32.totalorder %s2314_s0, 4 }
  0x2d   : > { %s3059_s19 = scalar_select %p2496_p11, 1, 0 }
  0x2e   : > { %s3061_s28 = scalar_select %p2503_p12, 1, 0 }
  0x2f   : > { %3060 = sst [smem:[#allocation27_spill]] %s3059_s19  ;;  %p2507_p13 = por %p480_p10, %p70_p2 }
  0x30   : > { %3062 = sst [smem:[#allocation28_spill]] %s3061_s28  ;;  %s2513_s21 = sand.u32 1, %s2294_s26  }
  0x31   : > { %s3063_s24 = scalar_select %p2507_p13, 1, 0 }
  0x32   : > { %s1726_s13 = sshll.u32 %s2513_s21, 2  ;;  %p2519_p3 = pnand %p1912_p1, %p2479_p4 }
  0x33   : > { %3064 = sst [smem:[#allocation29_spill]] %s3063_s24  ;;  %s1727_s12 = sshll.u32 %s2310_s30, 6 }
  0x34   : > { %s3065_s18 = scalar_select %p2519_p3, 1, 0 }
  0x35   : > { %s3066_s1 = sld [smem:[#allocation35_spill]]  ;;  %s528_s24 = scalar_lea.vmem [#allocation5], %s1726_s13 }
  0x36   : > { %s535_s14 = sshll.u32 %s528_s24, 4  ;;  %p2531_p0 = pnand %p1912_p1, %p2492_p9  ;;  %s2535_s14 = int_to_ptr.vmem [resolvable:$true] %s535_s14 }
  0x37   : > { %s3068_s7 = sand.u32 1, %s2314_s0   ;;  %p3013_p4 = pneg %p2519_p3 }
  0x38   : > { %s3067_s16 = scalar_select %p2531_p0, 1, 0 }
  0x39   : > { %s2539_s4 = scalar_lea.sflag [#allocation6], %s3068_s7 }
  0x3b   : > { %s2527_s11 = scalar_lea.hbm %s3066_s1, %s1727_s12  ;;  %s2035_s13 = scalar_lea.hbm %s3066_s1, 128 }
  0x3c   : > { %s2030_s3 = scalar_lea.hbm %s2527_s11, 64  ;;  %p2036_p8 = scmp.lt.u32.totalorder %s2527_s11, %s3066_s1 }
  0x3d   : > { %p2031_p2 = scmp.ne.s32.totalorder %s2527_s11, %s2030_s3  ;;  %p2037_p9 = scmp.lt.u32.totalorder %s2035_s13, %s2030_s3 }
  0x3e   : > { %p2039_p1 = scmp.lt.u32.totalorder %s2030_s3, %s2527_s11 }
  0x3f   : > { %p2033_p6 = pnand %p3013_p4, %p2031_p2  ;;  %p2038_p10 = por %p2037_p9, %p2036_p8 }
  0x41   : > { %p2034_p7 = pneg %p2033_p6  ;;  %p2040_p13 = por %p2039_p1, %p2038_p10 }
  0x43   : > { %p2041_p12 = pnand %p2040_p13, %p2034_p7 }
  0x45   : > { %2044 = shalt.err (!%p2041_p12)
}
  0x46   : > { %s2045_s7 = scalar_lea.vmem %s2535_s14, 64  ;;  %s2316_s20 = smov [#allocation5]  }
  0x47   : > { %p2046_p2 = scmp.ne.s32.totalorder %s2535_s14, %s2045_s7  ;;  %s2050_s10 = sshll.u32 %s2316_s20, 4  ;;  %s2051_s10 = int_to_ptr.vmem [resolvable:$false] %s2050_s10 }
  0x48   : > { %s2052_s12 = scalar_lea.vmem %s2051_s10, 128  ;;  %p2053_p5 = scmp.lt.s32.totalorder %s2535_s14, %s2051_s10 }
  0x49   : > { %p2048_p6 = pnand %p2046_p2, %p3013_p4  ;;  %p2054_p8 = scmp.lt.s32.totalorder %s2052_s12, %s2045_s7 }
  0x4b   : > { %p2049_p11 = pneg %p2048_p6  ;;  %p2055_p9 = por %p2054_p8, %p2053_p5 }
  0x4d   : > { %p2056_p10 = pnand %p2055_p9, %p2049_p11 }
  0x4f   : > { %2059 = shalt.err (!%p2056_p10)
}
  0x50   : > { %1898 = dma.hbm_to_vmem [thread:$0]  (!%p2519_p3), %s2527_s11, 64, %s2535_s14, %s2539_s4  }
  0x51   : > { %p1735_p12 = scmp.ge.s32.totalorder %s2314_s0, 1  ;;  %p661_p13 = scmp.lt.s32.totalorder %s2314_s0, 5 }
  0x52   : > { %s3006_s3 = sand.u32 1, %s2282_s23   ;;  %s47_s24 = sadd.s32 1, %s2306_s29 }
  0x53   : > { %p2570_p5 = pnand %p1735_p12, %p661_p13  ;;  %p48_p11 = scmp.ge.s32.totalorder %s47_s24, 2 }
  0x54   : > { %s1728_s28 = sshll.u32 %s3006_s3, 4  ;;  %s1786_s7 = sshll.u32 %s2306_s29, 8 }
  0x55   : > { %s3069_s13 = scalar_select %p2570_p5, 1, 0 }
  0x56   : > { %s3139_s24 = smov (%p48_p11, %s47_s24), 0  ;;  %s3071_s11 = sadd.s32 1, %s2310_s30 }
  0x57   : > { %3070 = sst [smem:[#allocation30_spill]] %s3139_s24  ;;  %s3141_s11 = smov (!%p48_p11, %s3071_s11), %s2310_s30 }
  0x58   : > { %s184_s14 = ssub.s32 %s2306_s29, %s3139_s24  ;;  %s3072_s5 = sld [smem:[#allocation39_spill]] }
  0x59   : > { %p52_p7 = scmp.ge.s32.totalorder %s3141_s11, 2  ;;  %p185_p1 = scmp.eq.s32.totalorder %s184_s14, 0 }
  0x5a   : > { %s570_s1 = scalar_lea.vmem [#allocation7], %s1728_s28  ;;  %s3074_s2 = sadd.s32 1, %s2282_s23 }
  0x5b   : > { %s577_s3 = sshll.u32 %s570_s1, 4  ;;  %s3143_s11 = smov (%p52_p7, %s3141_s11), 0  ;;  %s2599_s3 = int_to_ptr.vmem [resolvable:$true] %s577_s3 }
  0x5c   : > { %3073 = sst [smem:[#allocation31_spill]] %s3143_s11  ;;  %s54_s27 = ssub.s32 %s2310_s30, %s3143_s11 }
  0x5d   : > { %s2595_s6 = scalar_select %p185_p1, %s2282_s23, %s3074_s2  }
  0x5e   : > { %s2588_s12 = scalar_lea.hbm %s3072_s5, %s1786_s7  ;;  %p55_p2 = scmp.eq.s32.totalorder %s54_s27, 0 }
  0x5f   : > { %3075 = sst [smem:[#allocation32_spill]] %s2595_s6  ;;  %s3076_s8 = sld [smem:[#allocation42_spill]] }
  0x60   : > { %s3077_s19 = sadd.s32 1, %s2294_s26  ;;  %s603_s14 = scalar_lea.vmem [#allocation8], %s1728_s28 }
  0x61   : > { %s2609_s1 = scalar_select %p55_p2, %s2294_s26, %s3077_s19  }
  0x62   : > { %s610_s22 = sshll.u32 %s603_s14, 4  ;;  %s3079_s2 = sand.u32 1, %s2314_s0   ;;  %s2611_s22 = int_to_ptr.vmem [resolvable:$true] %s610_s22 }
  0x63   : > { %3078 = sst [smem:[#allocation33_spill]] %s2609_s1  ;;  %s2615_s11 = scalar_lea.sflag [#allocation9], %s3079_s2 }
  0x64   : > { %p2621_p8 = pneg %p2531_p0 }
  0x65   : > { %s2604_s10 = scalar_lea.hbm %s3076_s8, %s1786_s7  ;;  %s2065_s28 = scalar_lea.hbm %s3076_s8, 512 }
  0x66   : > { %s2060_s27 = scalar_lea.hbm %s2604_s10, 256  ;;  %p2066_p12 = scmp.lt.u32.totalorder %s2604_s10, %s3076_s8 }
  0x67   : > { %p2061_p6 = scmp.ne.s32.totalorder %s2604_s10, %s2060_s27  ;;  %p2067_p13 = scmp.lt.u32.totalorder %s2065_s28, %s2060_s27 }
  0x68   : > { %s3080_s24 = scalar_select %p2621_p8, 1, 0 }
  0x69   : > { %p2063_p9 = pnand %p2621_p8, %p2061_p6  ;;  %p2068_p11 = por %p2067_p13, %p2066_p12 }
  0x6a   : > { %p2069_p7 = scmp.lt.u32.totalorder %s2060_s27, %s2604_s10 }
  0x6b   : > { %p2064_p10 = pneg %p2063_p9 }
  0x6c   : > { %p2070_p1 = por %p2069_p7, %p2068_p11 }
  0x6e   : > { %p2071_p2 = pnand %p2070_p1, %p2064_p10 }
  0x70   : > { %2074 = shalt.err (!%p2071_p2)
}
  0x71   : > { %s2075_s2 = scalar_lea.vmem %s2611_s22, 256  ;;  %s2317_s19 = smov [#allocation8]  }
  0x72   : > { %p2076_p6 = scmp.ne.s32.totalorder %s2611_s22, %s2075_s2  ;;  %s2080_s7 = sshll.u32 %s2317_s19, 4  ;;  %s2081_s7 = int_to_ptr.vmem [resolvable:$false] %s2080_s7 }
  0x73   : > { %s2082_s20 = scalar_lea.vmem %s2081_s7, 512  ;;  %p2083_p5 = scmp.lt.s32.totalorder %s2611_s22, %s2081_s7 }
  0x74   : > { %p2078_p9 = pnand %p2076_p6, %p2621_p8  ;;  %p2084_p3 = scmp.lt.s32.totalorder %s2082_s20, %s2075_s2 }
  0x76   : > { %p2079_p4 = pneg %p2078_p9  ;;  %p2085_p12 = por %p2084_p3, %p2083_p5 }
  0x78   : > { %p2086_p13 = pnand %p2085_p12, %p2079_p4 }
  0x7a   : > { %2089 = shalt.err (!%p2086_p13)
}
  0x7b   : > { %s2318_s27 = smov 64   ;;  %s2319_s28 = smov 4  }
  0x7c   : > { %1904 = dma.hbm_to_vmem [thread:$0]  (!%p2531_p0), %s2604_s10, 256, %s2611_s22, %s2615_s11, %s2318_s27, %s2318_s27, %s2319_s28  }
  0x7d   : > { %s1724_s14 = sshll.u32 %s2513_s21, 3  ;;  %s1725_s2 = sshll.u32 %s2310_s30, 7 }
  0x7e   : > { %s3081_s20 = sld [smem:[#allocation34_spill]]  ;;  %s510_s1 = scalar_lea.vmem [#allocation2], %s1724_s14 }
  0x7f   : > { %s517_s26 = sshll.u32 %s510_s1, 4  ;;  %s507_s6 = scalar_lea.sflag [#allocation3], %s2513_s21  ;;  %s518_s26 = int_to_ptr.vmem [resolvable:$true] %s517_s26 }
  0x80   : > { %p3082_p4 = scmp.ne.s32.totalorder %s3065_s18, 0 }
  0x82   : > { %p3083_p5 = pneg %p3082_p4 }
  0x84   : > { %s2653_s8 = scalar_lea.hbm %s3081_s20, %s1725_s2  ;;  %s2095_s19 = scalar_lea.hbm %s3081_s20, 256 }
  0x85   : > { %s2090_s0 = scalar_lea.hbm %s2653_s8, 128  ;;  %p2096_p7 = scmp.lt.u32.totalorder %s2653_s8, %s3081_s20 }
  0x86   : > { %p2091_p3 = scmp.ne.s32.totalorder %s2653_s8, %s2090_s0  ;;  %p2097_p1 = scmp.lt.u32.totalorder %s2095_s19, %s2090_s0 }
  0x87   : > { %p2099_p6 = scmp.lt.u32.totalorder %s2090_s0, %s2653_s8 }
  0x88   : > { %p2093_p10 = pnand %p2091_p3, %p3083_p5  ;;  %p2098_p2 = por %p2097_p1, %p2096_p7 }
  0x8a   : > { %p2094_p11 = pneg %p2093_p10  ;;  %p2100_p9 = por %p2099_p6, %p2098_p2 }
  0x8c   : > { %p2101_p12 = pnand %p2100_p9, %p2094_p11 }
  0x8e   : > { %2104 = shalt.err (!%p2101_p12)
}
  0x8f   : > { %s2105_s21 = scalar_lea.vmem %s518_s26, 128  ;;  %p3084_p3 = pmov %p3083_p5 }
  0x90   : > { %p2106_p13 = scmp.ne.s32.totalorder %s518_s26, %s2105_s21  ;;  %s2320_s1 = smov [#allocation2]  }
  0x91   : > { %s2110_s14 = sshll.u32 %s2320_s1, 4  ;;  %s2111_s14 = int_to_ptr.vmem [resolvable:$false] %s2110_s14 }
  0x92   : > { %p2108_p5 = pnand %p2106_p13, %p3084_p3  ;;  %s2112_s22 = scalar_lea.vmem %s2111_s14, 256 }
  0x93   : > { %p2113_p0 = scmp.lt.s32.totalorder %s518_s26, %s2111_s14  ;;  %p2114_p8 = scmp.lt.s32.totalorder %s2112_s22, %s2105_s21 }
  0x94   : > { %p2109_p10 = pneg %p2108_p5 }
  0x95   : > { %p2115_p1 = por %p2114_p8, %p2113_p0 }
  0x97   : > { %p2116_p7 = pnand %p2115_p1, %p2109_p10 }
  0x99   : > { %2119 = shalt.err (!%p2116_p7)
}
  0x9a   : > { %1895 = dma.hbm_to_vmem [thread:$0]  (!%p3082_p4), %s2653_s8, 128, %s518_s26, %s507_s6  }
  0x9b   : > { %s2120_s0 = scalar_lea.hbm %s2588_s12, 256  ;;  %p3085_p2 = scmp.ne.s32.totalorder %s3080_s24, 0 }
  0x9c   : > { %p2121_p11 = scmp.ne.s32.totalorder %s2588_s12, %s2120_s0  ;;  %s2125_s2 = scalar_lea.hbm %s3072_s5, 512 }
  0x9d   : > { %p2126_p0 = scmp.lt.u32.totalorder %s2588_s12, %s3072_s5  ;;  %p2127_p8 = scmp.lt.u32.totalorder %s2125_s2, %s2120_s0 }
  0x9e   : > { %p2123_p6 = pnand %p2121_p11, %p3085_p2  ;;  %p2129_p13 = scmp.lt.u32.totalorder %s2120_s0, %s2588_s12 }
  0x9f   : > { %p2128_p12 = por %p2127_p8, %p2126_p0 }
  0xa0   : > { %p2124_p9 = pneg %p2123_p6 }
  0xa1   : > { %p2130_p3 = por %p2129_p13, %p2128_p12 }
  0xa3   : > { %p2131_p5 = pnand %p2130_p3, %p2124_p9 }
  0xa5   : > { %2134 = shalt.err (!%p2131_p5)
}
  0xa6   : > { %s2135_s6 = scalar_lea.vmem %s2599_s3, 256  ;;  %s2321_s8 = smov [#allocation7]  }
  0xa7   : > { %p2136_p4 = scmp.ne.s32.totalorder %s2599_s3, %s2135_s6  ;;  %s2140_s26 = sshll.u32 %s2321_s8, 4  ;;  %s2141_s26 = int_to_ptr.vmem [resolvable:$false] %s2140_s26 }
  0xa8   : > { %s2142_s18 = scalar_lea.vmem %s2141_s26, 512  ;;  %p2143_p7 = scmp.lt.s32.totalorder %s2599_s3, %s2141_s26 }
  0xa9   : > { %p2138_p10 = pnand %p2136_p4, %p3085_p2  ;;  %p2144_p11 = scmp.lt.s32.totalorder %s2142_s18, %s2135_s6 }
  0xab   : > { %p2139_p1 = pneg %p2138_p10  ;;  %p2145_p6 = por %p2144_p11, %p2143_p7 }
  0xad   : > { %p2146_p0 = pnand %p2145_p6, %p2139_p1 }
  0xaf   : > { %2149 = shalt.err (!%p2146_p0)
}
  0xb0   : > { %p3086_p9 = scmp.ne.s32.totalorder %s3067_s16, 0  ;;  %s1734_s1 = sshll.u32 %s2306_s29, 4 }
  0xb1   : > { %s3087_s14 = sand.u32 1, %s2282_s23   ;;  %s3088_s9 = sld [smem:[#allocation43_spill]] }
  0xb2   : > { %1901 = dma.hbm_to_vmem [thread:$0]  (!%p3086_p9), %s2588_s12, 256, %s2599_s3, %s2539_s4, %s2318_s27, %s2318_s27, %s2319_s28  }
  0xb3   : > { %s623_s22 = scalar_lea.vmem [#allocation10], %s3087_s14 }
  0xb4   : > { %s630_s0 = sshll.u32 %s623_s22, 4  ;;  %s631_s0 = int_to_ptr.vmem [resolvable:$true] %s630_s0 }
  0xb7   : > { %s628_s2 = scalar_lea.hbm %s3088_s9, %s1734_s1  ;;  %s2155_s8 = scalar_lea.hbm %s3088_s9, 32 }
  0xb8   : > { %s2150_s7 = scalar_lea.hbm %s628_s2, 16  ;;  %p2156_p3 = scmp.lt.u32.totalorder %s628_s2, %s3088_s9 }
  0xb9   : > { %p2151_p8 = scmp.ne.s32.totalorder %s628_s2, %s2150_s7  ;;  %p2157_p5 = scmp.lt.u32.totalorder %s2155_s8, %s2150_s7 }
  0xba   : > { %p2159_p10 = scmp.lt.u32.totalorder %s2150_s7, %s628_s2 }
  0xbb   : > { %p2153_p12 = pnand %p2151_p8, %p3085_p2  ;;  %p2158_p4 = por %p2157_p5, %p2156_p3 }
  0xbd   : > { %p2154_p13 = pneg %p2153_p12  ;;  %p2160_p1 = por %p2159_p10, %p2158_p4 }
  0xbf   : > { %p2161_p7 = pnand %p2160_p1, %p2154_p13 }
  0xc1   : > { %2164 = shalt.err (!%p2161_p7)
}
  0xc2   : > { %s2165_s3 = scalar_lea.vmem %s631_s0, 16  ;;  %s2322_s12 = smov [#allocation10]  }
  0xc3   : > { %p2166_p11 = scmp.ne.s32.totalorder %s631_s0, %s2165_s3  ;;  %s2170_s27 = sshll.u32 %s2322_s12, 4  ;;  %s2171_s27 = int_to_ptr.vmem [resolvable:$false] %s2170_s27 }
  0xc4   : > { %s2172_s28 = scalar_lea.vmem %s2171_s27, 32  ;;  %p2173_p8 = scmp.lt.s32.totalorder %s631_s0, %s2171_s27 }
  0xc5   : > { %p2168_p6 = pnand %p2166_p11, %p3085_p2  ;;  %p2174_p12 = scmp.lt.s32.totalorder %s2172_s28, %s2165_s3 }
  0xc7   : > { %p2169_p0 = pneg %p2168_p6  ;;  %p2175_p9 = por %p2174_p12, %p2173_p8 }
  0xc9   : > { %p2176_p3 = pnand %p2175_p9, %p2169_p0 }
  0xcb   : > { %2179 = shalt.err (!%p2176_p3)
}
  0xcc   : > { %p3089_p5 = scmp.ne.s32.totalorder %s3067_s16, 0  ;;  %p3090_p13 = scmp.ne.s32.totalorder %s3069_s13, 0 }
  0xcd   : > { %s2722_s24 = sand.u32 (!%p3090_p13), 1, %s2290_s25   ;;  %p3091_p2 = scmp.ne.s32.totalorder (!%p3090_p13), %s3057_s15, 0 }
  0xce   : > { %1907 = dma.hbm_to_vmem [thread:$0]  (!%p3089_p5), %s628_s2, 16, %s631_s0, %s2615_s11  }
  0xcf   : > { %665 = sbr.rel (%p3090_p13) target bundleno = 2699 (0xa8b), region = 84  ;;  %s3023_s18 = sshll.u32 (!%p3090_p13), %s2722_s24, 3 }
  0xd0   : > { %s668_s1 = scalar_lea.sflag (!%p3090_p13), [#allocation3], %s2722_s24  ;;  %s2728_s14 = scalar_lea.vmem (!%p3090_p13), [#allocation2], %s3023_s18 }
  0xd6   : > { %2253 = dma.done.wait (%p3091_p2), %s668_s1, 128  }
  0xd7   : > { %2255 = vsyncadd (%p3091_p2), %s668_s1, 4294967168  ;;  %s676_s16 = sand.u32 1, %s2465_s17   ;;  %s1737_s13 = sshll.u32 %s2722_s24, 2 }
  0xd8   : > { %s677_s11 = scalar_lea.sflag [#allocation6], %s676_s16  ;;  %s2736_s22 = scalar_lea.vmem [#allocation5], %s1737_s13 }
  0xd9   : > { %2257 = dma.done.wait (%p3091_p2), %s677_s11, 64  }
  0xda   : > { %2259 = vsyncadd (%p3091_p2), %s677_s11, 4294967232  ;;  %s3092_s0 = sld [smem:[#allocation17_spill]]  ;;  %s3093_s10 = sld [smem:[#allocation27_spill]] }
  0xe0   : > { %s687_s19 = sand.u32 1, %s3092_s0   ;;  %p3094_p9 = scmp.ne.s32.totalorder %s3093_s10, 0 }
  0xe1   : > { %s2743_s2 = sshll.u32 %s687_s19, 4 }
  0xe2   : > { %2261 = dma.done.wait (%p3094_p9), %s677_s11, 256  }
  0xe3   : > { %2263 = vsyncadd (%p3094_p9), %s677_s11, 4294967040  ;;  %s695_s17 = scalar_lea.sflag [#allocation9], %s676_s16 }
  0xe4   : > { %2265 = dma.done.wait (%p3094_p9), %s695_s17, 272  }
  0xe5   : > { %2267 = vsyncadd (%p3094_p9), %s695_s17, 4294967024  ;;  %s3095_s15 = sld [smem:[#allocation22_spill]]  ;;  %s3097_s1 = sld [smem:[#allocation36_spill]] }
  0xe6   : > { %s3098_s0 = sld [smem:[#allocation37_spill]]  ;;  %s3099_s7 = sld [smem:[#allocation38_spill]] }
  0xe7   : > { %s3100_s20 = sld [smem:[#allocation41_spill]]  ;;  %s3101_s27 = sld [smem:[#allocation45_spill]] }
  0xe8   : > { %s3102_s29 = sld [smem:[#allocation44_spill]]  ;;  %s3103_s25 = sld [smem:[#allocation46_spill]] }
  0xe9   : > { %s3104_s17 = sld [smem:[#allocation47_spill]]  ;;  %s2801_s5 = scalar_lea.vmem [#allocation10], %s687_s19 }
  0xea   : > { %s3105_s9 = sshll.u32 %s2722_s24, 3 }
  0xeb   : > { %p809_p4 = scmp.lt.s32.totalorder %s3095_s15, 1  ;;  %p1749_p10 = scmp.ne.s32.totalorder %s3095_s15, 0 }
  0xec   : > { %v849_v0 = vld [vmem:[%s2728_s14] sm:$0xff] (!%p1749_p10)  ;;  %vm850_vm0 = vcmask (!%p1749_p10), 261120  }
  0xed   : > { %s2757_s6 = scalar_select %p809_p4, %s3095_s15, 1 }
  0xee   : > { %848 = sbr.rel (%p1749_p10) target bundleno = 246 (0xf6), region = 108 }
  0xef   : > { %s1788_s8 = sshll.u32 %s2757_s6, 4  ;;  %s829_s26 = scalar_lea.vmem %s3100_s20, %s2757_s6 }
  0xf0   : > { %s2767_s16 = scalar_lea.vmem %s3097_s1, %s1788_s8  ;;  %s2772_s10 = scalar_lea.vmem %s3098_s0, %s1788_s8 }
  0xf1   : > { %s2777_s18 = scalar_lea.vmem %s3099_s7, %s1788_s8  ;;  %s1791_s4 = sshll.u32 %s2757_s6, 5 }
  0xf2   : > { %s837_s28 = scalar_lea.vmem %s3101_s27, %s2757_s6  ;;  %s2791_s13 = scalar_lea.vmem %s3102_s29, %s1791_s4 }
  0xf3   : > { %s840_s21 = scalar_lea.vmem %s3103_s25, %s2757_s6  ;;  %s843_s23 = scalar_lea.vmem %s3104_s17, %s2757_s6 }
  0xf4   : > { %s2805_s20 = scalar_lea.vmem [#allocation11], %s3105_s9 }
  0xf5   : > { %851 = vst.msk [vmem:[%s2805_s20] sm:$0xff] %vm850_vm0, %v849_v0 }
  0xf6 PF: > { %vm855_vm1 = vcmask 261120   ;;  %v2006_v8 = vld [vmem:[%s2767_s16] sm:$0xff]   ;;  %v2323_v10 = vmov 0.0   ;;  %v2008_v11 = vld [vmem:[%s2767_s16 + $0x8] sm:$0xff]   ;;  %vm2324_vm2 = vmmov 0   ;;  %s3106_s30 = sld [smem:[#allocation40_spill]] }
  0xf7   : > { %v2007_v9 = vld [vmem:[%s2772_s10] sm:$0xff]   ;;  %1816 = vmatprep.subr.bf16.mxu0 %v2323_v10  ;;  %1824 = vmatprep.subr.bf16.mxu1 %v2323_v10  ;;  %v2009_v12 = vld [vmem:[%s2772_s10 + $0x8] sm:$0xff]   ;;  %vm1122_vm3 = vcmask 1043456   ;;  %v1058_v42 = vld [vmem:[%s2736_s22] sm:$0xf]  ;;  %vm1106_vm4 = vcmask 64512  }
  0xf8   : > { %1817 = vmatpush3.bf16.msra.mxu0 %v2006_v8  ;;  %1825 = vmatpush3.bf16.msra.mxu1 %v2007_v9  ;;  %v1751_v19 = vld [vmem:[%s829_s26] ss:$0 sm:$0xff]  ;;  %v2011_v24 = vld [vmem:[%s2777_s18 + $0x8] sm:$0xff]   ;;  %v1059_v43 = vunpack.c.l.bf16 %v1058_v42  ;;  %s3111_s16 = scalar_lea.vmem [#allocation8], %s2743_s2  ;;  %vm1365_vm5 = vcmask 523264  }
  0xf9   : > { %1818 = vmatprep.subr.bf16.mxu0 %v2323_v10  ;;  %1826 = vmatprep.subr.bf16.mxu1 %v2323_v10  ;;  %v2010_v22 = vld [vmem:[%s2777_s18] sm:$0xff]   ;;  %s3109_s18 = scalar_lea.vmem [#allocation7], %s2743_s2  ;;  %s3112_s10 = smov %s3111_s16 }
  0xfa   : > { %1820 = vmatprep.mubr.msk.bf16.mxu0 %vm2324_vm2, %v2323_v10  ;;  %1828 = vmatprep.mubr.msk.bf16.mxu1 %vm2324_vm2, %v2323_v10  ;;  %v2012_v56 = vld [vmem:[%s3109_s18] sm:$0xff]   ;;  %s3110_s22 = smov %s3109_s18 }
  0xfb   : > { %v2013_v57 = vld [vmem:[%s3110_s22 + $0x8] sm:$0xff]  }
  0xfc   : > { %v2811_v1 = vld [vmem:[%s2805_s20] sm:$0xff]  ;;  %1819 = vmatpush3.bf16.msra.mxu0 %v2008_v11  ;;  %1827 = vmatpush3.bf16.msra.mxu1 %v2009_v12  ;;  %s3107_s14 = scalar_lea.vmem %s3106_s30, %s2757_s6 }
  0xfd   : > { %v856_v2 = vsel %vm855_vm1, %v2811_v1, 0.0  ;;  %1832 = vmatprep.subr.bf16.mxu0 %v2323_v10  ;;  %1840 = vmatprep.subr.bf16.mxu1 %v2323_v10  ;;  %v1750_v17 = vld [vmem:[%s3107_s14] ss:$0 sm:$0xff] }
  0xfe   : > { %857 = vadd.xlane.f32.xlu0 %v856_v2 }
 0x18b   : > { %v858_v3 = vpop.xlane.xlu0 %857 }
 0x18c   : > { %v860_v4 = vmul.f32 0.03125, %v858_v3 }
 0x18e   : > { %v861_v5 = vsub.f32 %v2811_v1, %v860_v4 }
 0x190   : > { %v862_v6 = vmul.f32 %v861_v5, %v861_v5 }
 0x192   : > { %v863_v7 = vsel %vm855_vm1, %v862_v6, 0.0 }
 0x193   : > { %864 = vadd.xlane.f32.xlu0 %v863_v7 }
 0x220   : > { %v865_v13 = vpop.xlane.xlu0 %864 }
 0x221   : > { %v866_v14 = vmul.f32 0.03125, %v865_v13 }
 0x223   : > { %v867_v15 = vadd.f32 1e-05, %v866_v14 }
 0x225   : > { %2020 = vrsqrt.f32 %v867_v15  ;;  %v2014_v15 = vld [vmem:[%s3111_s16] sm:$0xff]  }
 0x22f   : > { %v2021_v16 = vpop.eup %2020 }
 0x230   : > { %v869_v18 = vmul.f32 %v2021_v16, %v861_v5  ;;  %v2016_v16 = vld [vmem:[%s2791_s13] sm:$0xff]  }
 0x232   : > { %v876_v20 = vmul.f32 %v1750_v17, %v869_v18  ;;  %v2017_v17 = vld [vmem:[%s2791_s13 + $0x8] sm:$0xff]  }
 0x234   : > { %v883_v21 = vadd.f32 %v1751_v19, %v876_v20 }
 0x236   : > { %v884_v23 = vpack.c.bf16 %v883_v21, %v883_v21 }
 0x238   : > { %1821 = vmatmul.mubr.msk.bf16.vlgmr.msra.gmra.mrb[0].mxu0 %vm855_vm1, %v884_v23  ;;  %1829 = vmatmul.mubr.msk.bf16.vlgmr.msra.gmra.mrb[0].mxu1 %vm855_vm1, %v884_v23 }
 0x239   : > { %1833 = vmatpush3.bf16.msra.mxu0 %v2010_v22  ;;  %1836 = vmatprep.mubr.msk.bf16.mxu0 %vm2324_vm2, %v2323_v10  ;;  %v1766_v22 = vld [vmem:[%s840_s21] ss:$0 sm:$0xff] }
 0x23a   : > { %1834 = vmatprep.subr.bf16.mxu0 %v2323_v10  ;;  %1842 = vmatprep.mubr.msk.bf16.mxu1 %vm2324_vm2, %v2323_v10 }
 0x23d   : > { %1835 = vmatpush3.bf16.msra.mxu0 %v2011_v24  ;;  %v1767_v24 = vld [vmem:[%s843_s23] ss:$0 sm:$0xff] }
 0x23e   : > { %1846 = vmatprep.subr.bf16.mxu0 %v2323_v10 }
 0x240   : > { %1837 = vmatmul.mubr.msk.bf16.vlgmr.msra.gmra.mrb[4].mxu0 %vm855_vm1, %v884_v23 }
 0x241   : > { %1848 = vmatprep.mubr.msk.bf16.mxu0 %vm2324_vm2, %v2323_v10 }
 0x30b   : > { %v938_v25 = vpop.f32.mrb[0].mxu0  ;;  %v994_v26 = vpop.f32.mrb[0].mxu1 }
 0x30c   : > { %v1057_v27 = vpack.c.bf16 %v994_v26, %v994_v26  ;;  %v1822_v28 = vpop.f32.mrb[1].mxu0  ;;  %v1830_v29 = vpop.f32.mrb[1].mxu1  ;;  %v1056_v36 = vpack.c.bf16 %v938_v25, %v938_v25 }
 0x30d   : > { %v941_v30 = vpop.f32.mrb[2].mxu0  ;;  %v997_v31 = vpop.f32.mrb[2].mxu1  ;;  %v2018_v28 = vld [vmem:[%s2791_s13 + $0x10] sm:$0xff]   ;;  %v2019_v29 = vld [vmem:[%s2791_s13 + $0x18] sm:$0xff]   ;;  %s3116_s13 = sld [smem:[#allocation22_spill]] }
 0x30e   : > { %v1064_v32 = vsel %vm855_vm1, %v1057_v27, 0  ;;  %v1823_v33 = vpop.f32.mrb[3].mxu0  ;;  %v1831_v34 = vpop.f32.mrb[3].mxu1  ;;  %v1768_v30 = vld [vmem:[%s2801_s5] ss:$0 sm:$0xff] }
 0x30f   : > { %1841 = vmatpush3.bf16.xpose.msra.mxu1 %v1064_v32 }
 0x310   : > { %1852 = vmatprep.subr.bf16.mxu1 %v2323_v10 }
 0x313   : > { %v1050_v35 = vpop.f32.mrb[4].mxu0  ;;  %p1778_p1 = scmp.ne.s32.totalorder %s3116_s13, 1 }
 0x314   : > { %v1118_v37 = vpack.c.bf16 %v1050_v35, %v1050_v35  ;;  %v1838_v38 = vpop.f32.mrb[5].mxu0  ;;  %s3117_s21 = sld [smem:[#allocation48_spill]] (!%p1778_p1)  ;;  %s3118_s17 = sld [smem:[#allocation49_spill]] (!%p1778_p1) }
 0x315   : > { %v1053_v39 = vpop.f32.mrb[6].mxu0  ;;  %v1772_v38 = vld [vmem:[%s837_s28] ss:$0 sm:$0xff] }
 0x316   : > { %v1124_v40 = vsel %vm1122_vm3, %v1118_v37, 0  ;;  %v1839_v41 = vpop.f32.mrb[7].mxu0  ;;  %1843 = vmatmul.mubr.msk.bf16.vlgmr.msra.gmra.mrb[4].mxu1 %vm855_vm1, %v1056_v36 }
 0x317   : > { %1847 = vmatpush3.bf16.msra.mxu0 %v1124_v40  ;;  %1856 = vmatprep.mubr.msk.bf16.mxu1 %vm2324_vm2, %v2323_v10 }
 0x318   : > { %1860 = vmatprep.subr.bf16.mxu0 %v2323_v10  ;;  %1853 = vmatpush3.bf16.msra.mxu1 %v2012_v56 }
 0x319   : > { %1854 = vmatprep.subr.bf16.mxu1 %v2323_v10 }
 0x31a   : > { %v1780_v56 = vld [vmem:[%s3118_s17] ss:$0 sm:$0xff] (!%p1778_p1) }
 0x31c   : > { %1855 = vmatpush3.bf16.msra.mxu1 %v2013_v57 }
 0x31d   : > { %1868 = vmatprep.subr.bf16.mxu1 %v2323_v10 }
 0x3e9   : > { %v1100_v44 = vpop.f32.mrb[4].mxu1 }
 0x3ea   : > { %v1101_v45 = vadd.f32 %v1100_v44, %v1059_v43  ;;  %v1844_v46 = vpop.f32.mrb[5].mxu1 }
 0x3eb   : > { %v1103_v47 = vpop.f32.mrb[6].mxu1 }
 0x3ec   : > { %v1845_v48 = vpop.f32.mrb[7].mxu1  ;;  %v1107_v49 = vsel %vm1106_vm4, %v1101_v45, -inf }
 0x3ed   : > { %1108 = vmax.xlane.f32.xlu1 %v1107_v49 }
 0x47a   : > { %v1109_v50 = vpop.xlane.xlu1 %1108 }
 0x47b   : > { %v1110_v51 = vsub.f32 %v1101_v45, %v1109_v50 }
 0x47d   : > { %v1111_v52 = vmul.f32 1.442695, %v1110_v51 }
 0x47f   : > { %2022 = vpow2.f32 %v1111_v52 }
 0x489   : > { %v2023_v53 = vpop.eup %2022 }
 0x48a   : > { %v1113_v54 = vsel %vm1106_vm4, %v2023_v53, 0.0  ;;  %v1116_v55 = vpack.c.bf16 %v2023_v53, %v2023_v53 }
 0x48b   : > { %1114 = vadd.xlane.f32.xlu1 %v1113_v54  ;;  %v1779_v54 = vld [vmem:[%s3117_s21] ss:$0 sm:$0xff] (!%p1778_p1) }
 0x48c   : > { %1849 = vmatmul.mubr.msk.bf16.vlgmr.msra.gmra.mrb[8].mxu0 %vm1106_vm4, %v1116_v55 }
 0x48d   : > { %1864 = vmatprep.mubr.msk.bf16.mxu0 %vm2324_vm2, %v2323_v10  ;;  %1861 = vmatpush3.bf16.msra.mxu0 %v2014_v15 }
 0x48e   : > { %1862 = vmatprep.subr.bf16.mxu0 %v2323_v10 }
 0x518   : > { %v1115_v58 = vpop.xlane.xlu1 %1114 }
 0x519   : > { %2024 = vrcp.f32 %v1115_v58 }
 0x523   : > { %v2025_v59 = vpop.eup %2024 }
 0x55f   : > { %v1160_v60 = vpop.f32.mrb[8].mxu0 }
 0x560   : > { %v1166_v61 = vmul.f32 %v2025_v59, %v1160_v60  ;;  %v1850_v62 = vpop.f32.mrb[9].mxu0 }
 0x561   : > { %v1163_v63 = vpop.f32.mrb[10].mxu0 }
 0x562   : > { %v1167_v0 = vpack.c.bf16 %v1166_v61, %v1166_v61  ;;  %v1851_v2 = vpop.f32.mrb[11].mxu0 }
 0x564   : > { %1857 = vmatmul.mubr.msk.bf16.vlgmr.msra.gmra.mrb[8].mxu1 %vm855_vm1, %v1167_v0 }
 0x565   : > { %1876 = vmatprep.mubr.msk.bf16.mxu1 %vm2324_vm2, %v2323_v10  ;;  %1869 = vmatpush3.bf16.msra.mxu1 %v2016_v16 }
 0x566   : > { %1870 = vmatprep.subr.bf16.mxu1 %v2323_v10 }
 0x569   : > { %1871 = vmatpush3.bf16.msra.mxu1 %v2017_v17 }
 0x56a   : > { %1872 = vmatprep.subr.bf16.mxu1 %v2323_v10 }
 0x56d   : > { %1873 = vmatpush3.bf16.msra.mxu1 %v2018_v28 }
 0x56e   : > { %1874 = vmatprep.subr.bf16.mxu1 %v2323_v10 }
 0x571   : > { %1875 = vmatpush3.bf16.msra.mxu1 %v2019_v29 }
 0x637   : > { %v1221_v3 = vpop.f32.mrb[8].mxu1 }
 0x638   : > { %v1227_v4 = vadd.f32 %v1221_v3, %v2811_v1  ;;  %v1858_v5 = vpop.f32.mrb[9].mxu1  ;;  %v2015_v1 = vld [vmem:[%s3112_s10 + $0x8] sm:$0xff]  }
 0x639   : > { %v1224_v6 = vpop.f32.mrb[10].mxu1  ;;  %1863 = vmatpush3.bf16.msra.mxu0 %v2015_v1 }
 0x63a   : > { %v1859_v7 = vpop.f32.mrb[11].mxu1  ;;  %v1230_v8 = vsel %vm855_vm1, %v1227_v4, 0.0 }
 0x63b   : > { %1231 = vadd.xlane.f32.xlu0 %v1230_v8 }
 0x6c8   : > { %v1232_v9 = vpop.xlane.xlu0 %1231 }
 0x6c9   : > { %v1233_v11 = vmul.f32 0.03125, %v1232_v9 }
 0x6cb   : > { %v1234_v12 = vsub.f32 %v1227_v4, %v1233_v11 }
 0x6cd   : > { %v1235_v13 = vmul.f32 %v1234_v12, %v1234_v12 }
 0x6cf   : > { %v1236_v14 = vsel %vm855_vm1, %v1235_v13, 0.0 }
 0x6d0   : > { %1237 = vadd.xlane.f32.xlu1 %v1236_v14 }
 0x75d   : > { %v1238_v18 = vpop.xlane.xlu1 %1237 }
 0x75e   : > { %v1239_v19 = vmul.f32 0.03125, %v1238_v18 }
 0x760   : > { %v1240_v20 = vadd.f32 1e-05, %v1239_v19 }
 0x762   : > { %2026 = vrsqrt.f32 %v1240_v20 }
 0x76c   : > { %v2027_v21 = vpop.eup %2026 }
 0x76d   : > { %v1242_v23 = vmul.f32 %v2027_v21, %v1234_v12 }
 0x76f   : > { %v1249_v25 = vmul.f32 %v1766_v22, %v1242_v23 }
 0x771   : > { %v1256_v26 = vadd.f32 %v1767_v24, %v1249_v25 }
 0x773   : > { %v1257_v27 = vpack.c.bf16 %v1256_v26, %v1256_v26 }
 0x775   : > { %1865 = vmatmul.mubr.msk.bf16.vlgmr.msra.gmra.mrb[12].mxu0 %vm855_vm1, %v1257_v27 }
 0x848   : > { %v1318_v31 = vpop.f32.mrb[12].mxu0 }
 0x849   : > { %v1319_v32 = vadd.f32 %v1768_v30, %v1318_v31  ;;  %v1866_v33 = vpop.f32.mrb[13].mxu0 }
 0x84a   : > { %v1321_v34 = vpop.f32.mrb[14].mxu0 }
 0x84b   : > { %v1324_v35 = vmax.f32 %v1319_v32, 0.0  ;;  %v1867_v36 = vpop.f32.mrb[15].mxu0 }
 0x84d   : > { %v1325_v37 = vpack.c.bf16 %v1324_v35, %v1324_v35 }
 0x84f   : > { %1877 = vmatmul.mubr.msk.bf16.vlgmr.msra.gmra.mrb[12].mxu1 %vm1365_vm5, %v1325_v37 }
 0x91f   : > { %1413 = sbr.rel (%p1778_p1) target bundleno = 2657 (0xa61), region = 112 }
 0x922   : > { %v1403_v39 = vpop.f32.mrb[12].mxu1 }
 0x923   : > { %v1404_v40 = vadd.f32 %v1772_v38, %v1403_v39  ;;  %v1878_v10 = vpop.f32.mrb[13].mxu1 }
 0x924   : > { %v1406_v41 = vpop.f32.mrb[14].mxu1 }
 0x925   : > { %v1409_v42 = vadd.f32 %v1404_v40, %v1227_v4  ;;  %v1879_v43 = vpop.f32.mrb[15].mxu1 }
 0x927   : > { %v1416_v44 = vsel %vm855_vm1, %v1409_v42, 0.0 }
 0x928   : > { %1417 = vadd.xlane.f32.xlu0 %v1416_v44 }
 0x9b5   : > { %v1418_v45 = vpop.xlane.xlu0 %1417 }
 0x9b6   : > { %v1419_v46 = vmul.f32 0.03125, %v1418_v45 }
 0x9b8   : > { %v1420_v47 = vsub.f32 %v1409_v42, %v1419_v46 }
 0x9ba   : > { %v1421_v48 = vmul.f32 %v1420_v47, %v1420_v47 }
 0x9bc   : > { %v1422_v49 = vsel %vm855_vm1, %v1421_v48, 0.0 }
 0x9bd   : > { %1423 = vadd.xlane.f32.xlu0 %v1422_v49 }
 0xa4a   : > { %v1424_v50 = vpop.xlane.xlu0 %1423 }
 0xa4b   : > { %v1425_v51 = vmul.f32 0.03125, %v1424_v50 }
 0xa4d   : > { %v1426_v52 = vadd.f32 1e-05, %v1425_v51 }
 0xa4f   : > { %2028 = vrsqrt.f32 %v1426_v52 }
 0xa59   : > { %v2029_v53 = vpop.eup %2028 }
 0xa5a   : > { %v1428_v55 = vmul.f32 %v2029_v53, %v1420_v47 }
 0xa5c   : > { %v1435_v57 = vmul.f32 %v1779_v54, %v1428_v55 }
 0xa5e   : > { %v1442_v58 = vadd.f32 %v1780_v56, %v1435_v57 }
 0xa60   : > { %1443 = vst.msk [vmem:[%s2805_s20] sm:$0xff] %vm855_vm1, %v1442_v58 }
 0xa61 PF: > { %s3119_s5 = sld [smem:[#allocation22_spill]] }
 0xa67   : > { %p1781_p7 = scmp.eq.s32.totalorder %s3119_s5, 1 }
 0xa68   : > { %1448 = vst.msk [vmem:[%s2805_s20] sm:$0xff] (!%p1781_p7), %vm855_vm1, %v1409_v42 }
 0xa69   : > { %1447 = sbr.rel (%p1781_p7) target bundleno = 2672 (0xa70), region = 116 }
 0xa70 PF: > { %s3120_s9 = sld [smem:[#allocation23_spill]]  ;;  %s3121_s25 = sld [smem:[#allocation28_spill]] }
 0xa71   : > { %s3122_s19 = sld [smem:[#allocation50_spill]]  ;;  %s1463_s12 = sshll.u32 %s2805_s20, 4  ;;  %s1464_s12 = int_to_ptr.vmem [resolvable:$true] %s1463_s12 }
 0xa72   : > { %s1450_s18 = scalar_lea.sflag [#allocation4], %s2722_s24  ;;  %s2180_s22 = scalar_lea.vmem %s1464_s12, 128 }
 0xa73   : > { %p2181_p11 = scmp.ne.s32.totalorder %s1464_s12, %s2180_s22  ;;  %s2325_s16 = smov [#allocation11]  }
 0xa74   : > { %s2184_s10 = sshll.u32 %s2325_s16, 4  ;;  %s2185_s10 = int_to_ptr.vmem [resolvable:$false] %s2184_s10 }
 0xa75   : > { %s2186_s2 = scalar_lea.vmem %s2185_s10, 256  ;;  %p2187_p12 = scmp.lt.s32.totalorder %s1464_s12, %s2185_s10 }
 0xa76   : > { %s1783_s29 = sshll.u32 %s3120_s9, 7  ;;  %p3123_p6 = scmp.ne.s32.totalorder %s3121_s25, 0 }
 0xa77   : > { %s2922_s15 = scalar_lea.hbm %s3122_s19, %s1783_s29  ;;  %p2188_p3 = scmp.lt.s32.totalorder %s2186_s2, %s2180_s22 }
 0xa78   : > { %p2182_p0 = pnand %p2181_p11, %p3123_p6 }
 0xa79   : > { %p2189_p5 = por %p2188_p3, %p2187_p12 }
 0xa7a   : > { %p2183_p8 = pneg %p2182_p0 }
 0xa7c   : > { %p2190_p13 = pnand %p2189_p5, %p2183_p8 }
 0xa7e   : > { %2193 = shalt.err (!%p2190_p13)
}
 0xa7f   : > { %s2194_s24 = scalar_lea.hbm %s2922_s15, 128  ;;  %s2198_s4 = scalar_lea.hbm %s3122_s19, 256 }
 0xa80   : > { %p2195_p2 = scmp.ne.s32.totalorder %s2922_s15, %s2194_s24  ;;  %p2199_p10 = scmp.lt.u32.totalorder %s2922_s15, %s3122_s19 }
 0xa81   : > { %p2200_p1 = scmp.lt.u32.totalorder %s2198_s4, %s2194_s24  ;;  %p2202_p11 = scmp.lt.u32.totalorder %s2194_s24, %s2922_s15 }
 0xa82   : > { %p2196_p9 = pnand %p2195_p2, %p3123_p6 }
 0xa83   : > { %p2201_p7 = por %p2200_p1, %p2199_p10 }
 0xa84   : > { %p2197_p4 = pneg %p2196_p9 }
 0xa85   : > { %p2203_p0 = por %p2202_p11, %p2201_p7 }
 0xa87   : > { %p2204_p8 = pnand %p2203_p0, %p2197_p4 }
 0xa89   : > { %2207 = shalt.err (!%p2204_p8)
}
 0xa8a   : > { %1890 = dma.vmem_to_hbm [thread:$0]  (%p3123_p6), %s1464_s12, 128, %s2922_s15, %s1450_s18  }
 0xa8b PF: > { %s3124_s1 = sld [smem:[#allocation26_spill]]  ;;  %s3125_s23 = sld [smem:[#allocation19_spill]] }
 0xa8c   : > { %s3126_s11 = sld [smem:[#allocation29_spill]] }
 0xa91   : > { %p1913_p12 = scmp.ge.s32.totalorder %s3124_s1, 2  ;;  %s1475_s0 = sand.u32 1, %s3125_s23  }
 0xa92   : > { %p3127_p3 = scmp.ne.s32.totalorder %s3126_s11, 0  ;;  %s1476_s13 = scalar_lea.sflag [#allocation4], %s1475_s0 }
 0xa94   : > { %p1909_p5 = pnand %p1913_p12, %p3127_p3 }
 0xa96   : > { %2269 = dma.done.wait (!%p1909_p5), %s1476_s13, 128  }
 0xa97   : > { %2271 = vsyncadd (!%p1909_p5), %s1476_s13, 4294967168  ;;  %s38_s0 = sadd.s32 1, %s3124_s1   ;;  %s3128_s21 = sld [smem:[#allocation17_spill]] }
 0xa98   : > { %p35_p13 = scmp.ge.s32.totalorder %s38_s0, 6   ;;  %s3129_s22 = sld [smem:[#allocation18_spill]] }
 0xa99   : > { %s3130_s23 = sld [smem:[#allocation32_spill]]  ;;  %s3131_s24 = sld [smem:[#allocation20_spill]] }
 0xa9a   : > { %s3132_s25 = sld [smem:[#allocation21_spill]]  ;;  %s3133_s26 = sld [smem:[#allocation33_spill]] }
 0xa9b   : > { %s3134_s27 = sld [smem:[#allocation24_spill]]  ;;  %s3135_s28 = sld [smem:[#allocation25_spill]] }
 0xa9c   : > { %s3136_s29 = sld [smem:[#allocation30_spill]]  ;;  %s3137_s30 = sld [smem:[#allocation31_spill]] }
 0xa9d   :  { %37 = sbr.rel (!%p35_p13) target bundleno = 31 (0x1f), region = 216 }
 0xaa4   :  { %1481 = vsyncpa [#allocation3], 1 }
 0xaa5   :  { %1483 = vsyncpa [#allocation3 + $0x1], 1 }
 0xaa6   :  { %1484 = vsyncpa [#allocation6], 1 }
 0xaa7   :  { %1486 = vsyncpa [#allocation6 + $0x1], 1 }
 0xaa8   :  { %1487 = vsyncpa [#allocation9], 1 }
 0xaa9   :  { %1489 = vsyncpa [#allocation9 + $0x1], 1 }
 0xaaa   :  { %1490 = vsyncpa [#allocation4], 1 }
 0xaab   :  { %1492 = vsyncpa [#allocation4 + $0x1], 1 }

</bundles_post_ra>
